<compile_context>
chip_gen: v7x
topology: tpu7x:2x2x1
jax: 0.10.0
libtpu: 0.0.40
codegen_flags: <defaults>
</compile_context>

<pallas_src>
import functools

import numpy as np
import jax
import jax.numpy as jnp
from jax import lax
from jax.experimental import pallas as pl
from jax.experimental.pallas import tpu as pltpu


def bilinear_upsample_matrix(length: int) -> np.ndarray:
    """(2L, L) interpolation matrix reproducing
    F.interpolate(scale_factor=2, mode='bilinear', align_corners=False) along one axis."""
    U = np.zeros((2 * length, length), dtype=np.float32)
    for o in range(2 * length):
        src = (o + 0.5) / 2.0 - 0.5
        src = max(src, 0.0)  # PyTorch clamps negative source coordinates to 0
        i0 = int(np.floor(src))
        frac = src - i0
        i0 = min(i0, length - 1)
        i1 = min(i0 + 1, length - 1)
        U[o, i0] += 1.0 - frac
        U[o, i1] += frac
    return U


def _shifted_matrices(U: np.ndarray, k: int):
    """k copies of U, row-shifted by (tap - k//2) with out-of-range rows zeroed.

    Folds the conv's zero padding and spatial tap offsets into the interpolation matrix,
    so each upsample matmul already produces the exact window the conv tap needs.
    """
    two_l = U.shape[0]
    pad = k // 2
    mats = []
    for t in range(k):
        s = t - pad
        m = np.zeros_like(U)
        lo, hi = max(0, -s), min(two_l, two_l - s)
        if hi > lo:
            m[lo:hi] = U[lo + s:hi + s]
        mats.append(m)
    return mats


def _upsample_conv_kernel(x_ref, uw_ref, lh_ref, wi_ref, b_ref, o_ref, *, k, n_r):
    """One batch element.

    x_ref : (c_in*H, W)              input, channels stacked along rows
    uw_ref: (W, n_r*k*128)           width upsample (+kw shift, + r-band lane placement)
    lh_ref: (n_r, R_p, c_in*H)       height upsample (+kh shift), block-diag over c_in
    wi_ref: (k, n_g*c_out, R_p)      I_{n_g} (x) conv-weights for each kw tap
    b_ref : (n_g*c_out, 1)           bias, tiled over the n_g row groups
    o_ref : (n_g*c_out, 128)         output rows (g, co), lanes (r, x) with y = g*n_r + r
    """
    band = k * 128

    # 1) Width-direction bilinear upsample for all kw taps at once (one MXU matmul).  The
    #    constant also places row-phase r's data at lane offset r*2W of each 128-lane band,
    #    so downstream values are already in final lane positions.
    tw = jnp.dot(x_ref[...], uw_ref[...], preferred_element_type=jnp.float32)

    # 2) Height-direction upsample for all kh taps, fused over input channels via the
    #    block-diagonal lh constants; n_r matmuls accumulated in f32.  Rows of `p` are
    #    (g, ci, kh); lanes are (kw, r, x).  All slices are static multiples of 128.
    p = jnp.dot(lh_ref[0], tw[:, :band], preferred_element_type=jnp.float32)
    for r in range(1, n_r):
        p = p + jnp.dot(lh_ref[r], tw[:, r * band:(r + 1) * band],
                        preferred_element_type=jnp.float32)

    # 3) Conv (contract over (ci, kh) rows within each kw lane band) + bias + ReLU, then a
    #    single dense, unmasked (n_g*c_out, 128) store.
    acc = jnp.dot(wi_ref[0], p[:, :128], preferred_element_type=jnp.float32)
    for kw in range(1, k):
        acc = acc + jnp.dot(wi_ref[kw], p[:, kw * 128:(kw + 1) * 128],
                            preferred_element_type=jnp.float32)
    o_ref[...] = jnp.maximum(acc + b_ref[...], 0.0).astype(o_ref.dtype)


def upsample_conv_layer(x, weight, bias, *, kernel_size):
    """x: (N, C_in, H, W) f32; weight: (C_out, C_in, K, K); bias: (C_out,)."""
    n, c_in, h, w = x.shape
    c_out = weight.shape[0]
    k = kernel_size
    assert k % 2 == 1, "only odd kernel_size yields a (2H, 2W) 'same' output with padding=k//2"
    assert 2 * w <= 128 and 128 % (2 * w) == 0, \
        "TODO(synk): wide-W path (2W >= 128) uses the natural lane-dense layout instead"

    n_r = 128 // (2 * w)            # output rows packed per 128-lane group
    assert (2 * h) % n_r == 0
    n_g = (2 * h) // n_r            # number of 128-lane row groups (y = g*n_r + r)
    R_p = n_g * c_in * k            # rows of the banded im2col intermediate
    CO = n_g * c_out                # output rows per batch element

    # ---- host-side constants (layout + fixed interpolation weights only) -----------------
    uhS = _shifted_matrices(bilinear_upsample_matrix(h), k)   # k x (2H, H)
    uwS = _shifted_matrices(bilinear_upsample_matrix(w), k)   # k x (2W, W)

    # Width constant: column index = r*(k*128) + kw*128 + r'*2W + x, nonzero only at r'=r.
    uw_all = np.zeros((w, n_r, k, n_r, 2 * w), np.float32)
    for r in range(n_r):
        for kw in range(k):
            uw_all[:, r, kw, r, :] = uwS[kw].T
    uw_all = uw_all.reshape(w, n_r * k * 128)

    # Height constants: LH[r][g*(c_in*k) + ci*k + kh, ci*H + hh] = UhS_kh[g*n_r + r, hh].
    lh_all = np.zeros((n_r, n_g, c_in, k, c_in, h), np.float32)
    for r in range(n_r):
        for g in range(n_g):
            for ci in range(c_in):
                for kh in range(k):
                    lh_all[r, g, ci, kh, ci, :] = uhS[kh][g * n_r + r, :]
    lh_all = lh_all.reshape(n_r, R_p, c_in * h)

    # Conv weights per kw tap, kron'd with I_{n_g} (im2col on the weight side).
    eye_g = jnp.eye(n_g, dtype=jnp.float32)
    wi = jnp.stack(
        [jnp.kron(eye_g, weight[:, :, :, kw].reshape(c_out, c_in * k).astype(jnp.float32))
         for kw in range(k)], axis=0)                                     # (k, CO, R_p)
    b_t = jnp.tile(bias.astype(jnp.float32), n_g).reshape(CO, 1)          # (CO, 1)
    x2 = x.astype(jnp.float32).reshape(n, c_in * h, w)                    # channel/row stacking

    kernel = functools.partial(_upsample_conv_kernel, k=k, n_r=n_r)

    out = pl.pallas_call(
        kernel,
        out_shape=jax.ShapeDtypeStruct((n, CO, 128), jnp.float32),
        grid=(n,),
        in_specs=[
            pl.BlockSpec((None, c_in * h, w), lambda i: (i, 0, 0)),       # x, one batch/step
            pl.BlockSpec((w, n_r * k * 128), lambda i: (0, 0)),           # width constant
            pl.BlockSpec((n_r, R_p, c_in * h), lambda i: (0, 0, 0)),      # height constants
            pl.BlockSpec((k, CO, R_p), lambda i: (0, 0, 0)),              # conv weights
            pl.BlockSpec((CO, 1), lambda i: (0, 0)),                      # bias
        ],
        out_specs=pl.BlockSpec((None, CO, 128), lambda i: (i, 0, 0)),
        compiler_params=pltpu.CompilerParams(dimension_semantics=("parallel",)),
    )(x2, jnp.asarray(uw_all), jnp.asarray(lh_all), wi, b_t)

    # Wrapper-side layout plumbing only: rows (g, co), lanes (r, x) -> (co, y=g*n_r+r, x).
    out = out.reshape(n, n_g, c_out, n_r, 2 * w)
    out = out.transpose(0, 2, 1, 3, 4).reshape(n, c_out, 2 * h, 2 * w)
    return out


if __name__ == "__main__":
    N, C_IN, C_OUT, K, H, W = 2, 4, 8, 3, 16, 16

    key = jax.random.PRNGKey(0)
    kx, kwt, kb = jax.random.split(key, 3)
    x = jax.random.normal(kx, (N, C_IN, H, W), jnp.float32)
    weight = 0.1 * jax.random.normal(kwt, (C_OUT, C_IN, K, K), jnp.float32)
    bias = 0.1 * jax.random.normal(kb, (C_OUT,), jnp.float32)

    out = jax.block_until_ready(upsample_conv_layer(x, weight, bias, kernel_size=K))
    assert out.shape == (N, C_OUT, 2 * H, 2 * W)

    # Pure-JAX reference (same align_corners=False bilinear semantics).
    uh = jnp.asarray(bilinear_upsample_matrix(H))
    uw = jnp.asarray(bilinear_upsample_matrix(W))
    up = jnp.einsum('uh,nchw,vw->ncuv', uh, x, uw)
    ref = lax.conv_general_dilated(up, weight, (1, 1), [(K // 2, K // 2)] * 2,
                                   dimension_numbers=('NCHW', 'OIHW', 'NCHW'))
    ref = jnp.maximum(ref + bias[None, :, None, None], 0.0)

    err = float(jnp.max(jnp.abs(out - ref)))
    assert jnp.allclose(out, ref, atol=1e-3, rtol=1e-3), f"max abs err {err}"
    print("KERNEL_OK")
</pallas_src>

<mosaic_0001>
module attributes {stable_mosaic.version = 11 : i64} {
  func.func @_upsample_conv_kernel(%arg0: i32, %arg1: memref<1x64x16xf32, #tpu.memory_space<vmem>>, %arg2: memref<16x1536xf32, #tpu.memory_space<vmem>>, %arg3: memref<4x96x64xf32, #tpu.memory_space<vmem>>, %arg4: memref<3x64x96xf32, #tpu.memory_space<vmem>>, %arg5: memref<64x1xf32, #tpu.memory_space<vmem>>, %arg6: memref<1x64x128xf32, #tpu.memory_space<vmem>>) attributes {dimension_semantics = [#tpu.dimension_semantics<parallel>], iteration_bounds = array<i64: 2>, scalar_prefetch = 0 : i64, scratch_operands = 0 : i64, tpu.core_type = #tpu.core_type<tc>, window_params = [{transform_indices = @transform_0, window_bounds = array<i64: 1, 64, 16>}, {pipeline_mode = #tpu.pipeline_mode<synchronous>, transform_indices = @transform_1, window_bounds = array<i64: 16, 1536>}, {pipeline_mode = #tpu.pipeline_mode<synchronous>, transform_indices = @transform_2, window_bounds = array<i64: 4, 96, 64>}, {pipeline_mode = #tpu.pipeline_mode<synchronous>, transform_indices = @transform_3, window_bounds = array<i64: 3, 64, 96>}, {pipeline_mode = #tpu.pipeline_mode<synchronous>, transform_indices = @transform_4, window_bounds = array<i64: 64, 1>}, {transform_indices = @transform_5, window_bounds = array<i64: 1, 64, 128>}]} {
    %c0 = arith.constant 0 : index
    %c0_0 = arith.constant 0 : index
    %c0_1 = arith.constant 0 : index
    %0 = vector.load %arg1[%c0, %c0_0, %c0_1] : memref<1x64x16xf32, #tpu.memory_space<vmem>>, vector<1x64x16xf32>
    %1 = vector.shape_cast %0 : vector<1x64x16xf32> to vector<64x16xf32>
    %c0_2 = arith.constant 0 : index
    %c0_3 = arith.constant 0 : index
    %2 = vector.load %arg2[%c0_2, %c0_3] : memref<16x1536xf32, #tpu.memory_space<vmem>>, vector<16x1536xf32>
    %cst = arith.constant dense<0.000000e+00> : vector<64x1536xf32>
    %3 = tpu.matmul %1, %2, %cst {dimension_numbers = #tpu.dot_dimension_numbers<[1], [0], [0], [1], [0, 0, 1, 1], [], []>} : vector<64x16xf32>, vector<16x1536xf32>, vector<64x1536xf32> -> vector<64x1536xf32>
    %c0_4 = arith.constant 0 : index
    %c0_5 = arith.constant 0 : index
    %c0_6 = arith.constant 0 : index
    %4 = vector.load %arg3[%c0_4, %c0_5, %c0_6] : memref<4x96x64xf32, #tpu.memory_space<vmem>>, vector<1x96x64xf32>
    %5 = vector.shape_cast %4 : vector<1x96x64xf32> to vector<96x64xf32>
    %6 = vector.extract_strided_slice %3 {offsets = [0, 0], sizes = [64, 384], strides = [1, 1]} : vector<64x1536xf32> to vector<64x384xf32>
    %cst_7 = arith.constant dense<0.000000e+00> : vector<96x384xf32>
    %7 = tpu.matmul %5, %6, %cst_7 {dimension_numbers = #tpu.dot_dimension_numbers<[1], [0], [0], [1], [0, 0, 1, 1], [], []>} : vector<96x64xf32>, vector<64x384xf32>, vector<96x384xf32> -> vector<96x384xf32>
    %c1 = arith.constant 1 : index
    %c0_8 = arith.constant 0 : index
    %c0_9 = arith.constant 0 : index
    %8 = vector.load %arg3[%c1, %c0_8, %c0_9] : memref<4x96x64xf32, #tpu.memory_space<vmem>>, vector<1x96x64xf32>
    %9 = vector.shape_cast %8 : vector<1x96x64xf32> to vector<96x64xf32>
    %10 = vector.extract_strided_slice %3 {offsets = [0, 384], sizes = [64, 384], strides = [1, 1]} : vector<64x1536xf32> to vector<64x384xf32>
    %cst_10 = arith.constant dense<0.000000e+00> : vector<96x384xf32>
    %11 = tpu.matmul %9, %10, %cst_10 {dimension_numbers = #tpu.dot_dimension_numbers<[1], [0], [0], [1], [0, 0, 1, 1], [], []>} : vector<96x64xf32>, vector<64x384xf32>, vector<96x384xf32> -> vector<96x384xf32>
    %12 = arith.addf %7, %11 : vector<96x384xf32>
    %c2 = arith.constant 2 : index
    %c0_11 = arith.constant 0 : index
    %c0_12 = arith.constant 0 : index
    %13 = vector.load %arg3[%c2, %c0_11, %c0_12] : memref<4x96x64xf32, #tpu.memory_space<vmem>>, vector<1x96x64xf32>
    %14 = vector.shape_cast %13 : vector<1x96x64xf32> to vector<96x64xf32>
    %15 = vector.extract_strided_slice %3 {offsets = [0, 768], sizes = [64, 384], strides = [1, 1]} : vector<64x1536xf32> to vector<64x384xf32>
    %cst_13 = arith.constant dense<0.000000e+00> : vector<96x384xf32>
    %16 = tpu.matmul %14, %15, %cst_13 {dimension_numbers = #tpu.dot_dimension_numbers<[1], [0], [0], [1], [0, 0, 1, 1], [], []>} : vector<96x64xf32>, vector<64x384xf32>, vector<96x384xf32> -> vector<96x384xf32>
    %17 = arith.addf %12, %16 : vector<96x384xf32>
    %c3 = arith.constant 3 : index
    %c0_14 = arith.constant 0 : index
    %c0_15 = arith.constant 0 : index
    %18 = vector.load %arg3[%c3, %c0_14, %c0_15] : memref<4x96x64xf32, #tpu.memory_space<vmem>>, vector<1x96x64xf32>
    %19 = vector.shape_cast %18 : vector<1x96x64xf32> to vector<96x64xf32>
    %20 = vector.extract_strided_slice %3 {offsets = [0, 1152], sizes = [64, 384], strides = [1, 1]} : vector<64x1536xf32> to vector<64x384xf32>
    %cst_16 = arith.constant dense<0.000000e+00> : vector<96x384xf32>
    %21 = tpu.matmul %19, %20, %cst_16 {dimension_numbers = #tpu.dot_dimension_numbers<[1], [0], [0], [1], [0, 0, 1, 1], [], []>} : vector<96x64xf32>, vector<64x384xf32>, vector<96x384xf32> -> vector<96x384xf32>
    %22 = arith.addf %17, %21 : vector<96x384xf32>
    %c0_17 = arith.constant 0 : index
    %c0_18 = arith.constant 0 : index
    %c0_19 = arith.constant 0 : index
    %23 = vector.load %arg4[%c0_17, %c0_18, %c0_19] : memref<3x64x96xf32, #tpu.memory_space<vmem>>, vector<1x64x96xf32>
    %24 = vector.shape_cast %23 : vector<1x64x96xf32> to vector<64x96xf32>
    %25 = vector.extract_strided_slice %22 {offsets = [0, 0], sizes = [96, 128], strides = [1, 1]} : vector<96x384xf32> to vector<96x128xf32>
    %cst_20 = arith.constant dense<0.000000e+00> : vector<64x128xf32>
    %26 = tpu.matmul %24, %25, %cst_20 {dimension_numbers = #tpu.dot_dimension_numbers<[1], [0], [0], [1], [0, 0, 1, 1], [], []>} : vector<64x96xf32>, vector<96x128xf32>, vector<64x128xf32> -> vector<64x128xf32>
    %c1_21 = arith.constant 1 : index
    %c0_22 = arith.constant 0 : index
    %c0_23 = arith.constant 0 : index
    %27 = vector.load %arg4[%c1_21, %c0_22, %c0_23] : memref<3x64x96xf32, #tpu.memory_space<vmem>>, vector<1x64x96xf32>
    %28 = vector.shape_cast %27 : vector<1x64x96xf32> to vector<64x96xf32>
    %29 = vector.extract_strided_slice %22 {offsets = [0, 128], sizes = [96, 128], strides = [1, 1]} : vector<96x384xf32> to vector<96x128xf32>
    %cst_24 = arith.constant dense<0.000000e+00> : vector<64x128xf32>
    %30 = tpu.matmul %28, %29, %cst_24 {dimension_numbers = #tpu.dot_dimension_numbers<[1], [0], [0], [1], [0, 0, 1, 1], [], []>} : vector<64x96xf32>, vector<96x128xf32>, vector<64x128xf32> -> vector<64x128xf32>
    %31 = arith.addf %26, %30 : vector<64x128xf32>
    %c2_25 = arith.constant 2 : index
    %c0_26 = arith.constant 0 : index
    %c0_27 = arith.constant 0 : index
    %32 = vector.load %arg4[%c2_25, %c0_26, %c0_27] : memref<3x64x96xf32, #tpu.memory_space<vmem>>, vector<1x64x96xf32>
    %33 = vector.shape_cast %32 : vector<1x64x96xf32> to vector<64x96xf32>
    %34 = vector.extract_strided_slice %22 {offsets = [0, 256], sizes = [96, 128], strides = [1, 1]} : vector<96x384xf32> to vector<96x128xf32>
    %cst_28 = arith.constant dense<0.000000e+00> : vector<64x128xf32>
    %35 = tpu.matmul %33, %34, %cst_28 {dimension_numbers = #tpu.dot_dimension_numbers<[1], [0], [0], [1], [0, 0, 1, 1], [], []>} : vector<64x96xf32>, vector<96x128xf32>, vector<64x128xf32> -> vector<64x128xf32>
    %36 = arith.addf %31, %35 : vector<64x128xf32>
    %c0_29 = arith.constant 0 : index
    %c0_30 = arith.constant 0 : index
    %37 = vector.load %arg5[%c0_29, %c0_30] : memref<64x1xf32, #tpu.memory_space<vmem>>, vector<64x1xf32>
    %38 = vector.broadcast %37 : vector<64x1xf32> to vector<64x128xf32>
    %39 = arith.addf %36, %38 : vector<64x128xf32>
    %cst_31 = arith.constant 0.000000e+00 : f32
    %40 = vector.broadcast %cst_31 : f32 to vector<64x128xf32>
    %41 = arith.maximumf %39, %40 : vector<64x128xf32>
    %c0_32 = arith.constant 0 : index
    %c0_33 = arith.constant 0 : index
    %c0_34 = arith.constant 0 : index
    %42 = vector.load %arg6[%c0_32, %c0_33, %c0_34] : memref<1x64x128xf32, #tpu.memory_space<vmem>>, vector<1x64x128xf32>
    %43 = vector.shape_cast %42 : vector<1x64x128xf32> to vector<64x128xf32>
    %44 = vector.shape_cast %41 : vector<64x128xf32> to vector<1x64x128xf32>
    tpu.vector_store %arg6[%c0_32, %c0_33, %c0_34], %44 {strides = array<i32>} : memref<1x64x128xf32, #tpu.memory_space<vmem>>, vector<1x64x128xf32>,
    return
  }
  func.func @transform_0(%arg0: i32) -> (i32, i32, i32) {
    %c0_i32 = arith.constant 0 : i32
    %c0_i32_0 = arith.constant 0 : i32
    %c0_i32_1 = arith.constant 0 : i32
    return %arg0, %c0_i32, %c0_i32_0 : i32, i32, i32
  }
  func.func @transform_1(%arg0: i32) -> (i32, i32) {
    %c0_i32 = arith.constant 0 : i32
    %c0_i32_0 = arith.constant 0 : i32
    %c0_i32_1 = arith.constant 0 : i32
    return %c0_i32, %c0_i32_0 : i32, i32
  }
  func.func @transform_2(%arg0: i32) -> (i32, i32, i32) {
    %c0_i32 = arith.constant 0 : i32
    %c0_i32_0 = arith.constant 0 : i32
    %c0_i32_1 = arith.constant 0 : i32
    %c0_i32_2 = arith.constant 0 : i32
    return %c0_i32, %c0_i32_0, %c0_i32_1 : i32, i32, i32
  }
  func.func @transform_3(%arg0: i32) -> (i32, i32, i32) {
    %c0_i32 = arith.constant 0 : i32
    %c0_i32_0 = arith.constant 0 : i32
    %c0_i32_1 = arith.constant 0 : i32
    %c0_i32_2 = arith.constant 0 : i32
    return %c0_i32, %c0_i32_0, %c0_i32_1 : i32, i32, i32
  }
  func.func @transform_4(%arg0: i32) -> (i32, i32) {
    %c0_i32 = arith.constant 0 : i32
    %c0_i32_0 = arith.constant 0 : i32
    %c0_i32_1 = arith.constant 0 : i32
    return %c0_i32, %c0_i32_0 : i32, i32
  }
  func.func @transform_5(%arg0: i32) -> (i32, i32, i32) {
    %c0_i32 = arith.constant 0 : i32
    %c0_i32_0 = arith.constant 0 : i32
    %c0_i32_1 = arith.constant 0 : i32
    return %arg0, %c0_i32, %c0_i32_0 : i32, i32, i32
  }
}

</mosaic_0001>

<bundles_post_ra>
// kernel: tpu_custom_call.1
= control target key start
LH: loop header
LB: loop body
LE: loop exit
PB: predicated region body
PF: predicated region fallthrough
CT: control target
= control target key end

     0   :  { %10 = vsyncpa [#allocation3], 0  ;;  %s5095_s0 = inlined_call_operand.vmem [shape: f32[2,64,16], index: 0, kind: input, shape index: {}]   ;;  %s5096_s1 = inlined_call_operand.vmem [shape: f32[16,1536], index: 1, kind: input, shape index: {}]   ;;  %s5097_s2 = inlined_call_operand.vmem [shape: f32[4,96,64], index: 2, kind: input, shape index: {}]   ;;  %s5098_s3 = inlined_call_operand.vmem [shape: f32[3,64,96], index: 3, kind: input, shape index: {}]   ;;  %s5099_s4 = inlined_call_operand.vmem [shape: f32[64,1], index: 4, kind: input, shape index: {}]   ;;  %s5100_s5 = inlined_call_operand.hbm [shape: f32[2,64,128], index: 5, kind: output, shape index: {}]  }
   0x1   :  { %12 = vsyncpa [#allocation3 + $0x1], 0  ;;  %s3956_s18 = smov 0   ;;  %s3958_s19 = smov 0  }
   0x2   :  { %s3960_s20 = smov 0   ;;  %s3962_s21 = smov 0  }
   0x3 LB: > { %s3977_s22 = sadd.s32 4294967295, %s3919_s21   ;;  %s2844_s23 = sadd.s32 4294967294, %s3919_s21   ;;  %s3919_s21 = sphi %s3962_s21, %s5106_s21   ;;  %s3915_s20 = sphi %s3960_s20, %s5105_s20   ;;  %s3911_s19 = sphi %s3958_s19, %s5104_s19   ;;  %s3907_s18 = sphi %s3956_s18, %s5103_s18  }
   0x4   : > { %s3981_s24 = sadd.s32 1, %s3919_s21   ;;  %s135_s25 = sadd.s32 1, %s3915_s20 }
   0x5   : > { %s132_s26 = ssub.s32 %s3919_s21, %s3981_s24  ;;  %p145_p0 = scmp.ne.s32.totalorder %s3915_s20, %s3911_s19 }
   0x6   : > { %p133_p1 = scmp.eq.s32.totalorder %s132_s26, 0  ;;  %p146_p2 = scmp.eq.s32.totalorder %s3977_s22, 1 }
   0x7   : > { %p151_p3 = scmp.ne.s32.totalorder %s3911_s19, %s3907_s18  ;;  %p152_p4 = scmp.eq.s32.totalorder %s2844_s23, 1 }
   0x8   : > { %s3992_s27 = scalar_select %p133_p1, %s3915_s20, %s135_s25  }
   0x9   : > { %p3994_p5 = por %p146_p2, %p145_p0  ;;  %p3998_p6 = por %p152_p4, %p151_p3 }
   0xa   : > { %p2847_p7 = scmp.ge.s32.totalorder %s3919_s21, 1  ;;  %p190_p8 = scmp.lt.s32.totalorder %s3919_s21, 3 }
   0xc   : > { %p191_p9 = pnand %p2847_p7, %p190_p8 }
   0xd   : > { %v232_v0 = vld [vmem:[%s5096_s1 + $0x8] sm:$0xff] (!%p191_p9)  ;;  %v231_v2 = vld [vmem:[%s5096_s1] sm:$0xff] (!%p191_p9)  ;;  %p218_p10 = scmp.lt.s32.totalorder (!%p191_p9), %s3977_s22, 1  ;;  %v3921_v5 = vmov (!%p191_p9), 0.0   ;;  %v234_v6 = vld [vmem:[%s5096_s1 + $0x18] sm:$0xff] (!%p191_p9)  ;;  %vm255_vm0 = vcmask (!%p191_p9), 130048  }
   0xe   : > { %194 = sbr.rel (%p191_p9) target bundleno = 988 (0x3dc), region = 40  ;;  %v244_v1 = vld [vmem:[%s5096_s1 + $0x68] sm:$0xff] (!%p191_p9)  ;;  %v243_v4 = vld [vmem:[%s5096_s1 + $0x60] sm:$0xff] (!%p191_p9)  ;;  %344 = vmatprep.mubr.f32.mxu0 (!%p191_p9), %v3921_v5  ;;  %368 = vmatprep.mubr.f32.mxu1 (!%p191_p9), %v3921_v5  ;;  %v246_v7 = vld [vmem:[%s5096_s1 + $0x78] sm:$0xff] (!%p191_p9)  ;;  %vm983_vm1 = vcmask (!%p191_p9), 523264   ;;  %vm2291_vm2 = vcmask (!%p191_p9), 785408  }
   0xf   : > { %v3462_v3 = vpack.c.bf16 (!%p191_p9), %v244_v1, %v232_v0  ;;  %v3464_v8 = vpack.c.bf16 (!%p191_p9), %v243_v4, %v231_v2  ;;  %v3466_v9 = vpack.c.bf16 (!%p191_p9), %v246_v7, %v234_v6  ;;  %v236_v10 = vld [vmem:[%s5096_s1 + $0x28] sm:$0xff] (!%p191_p9)  ;;  %v233_v12 = vld [vmem:[%s5096_s1 + $0x10] sm:$0xff] (!%p191_p9)  ;;  %v235_v15 = vld [vmem:[%s5096_s1 + $0x20] sm:$0xff] (!%p191_p9)  ;;  %s215_s10 = sand.u32 (!%p191_p9), 1, %s3911_s19   ;;  %s3077_s13 = sshll.u32 (!%p191_p9), %s3977_s22, 10 }
  0x10   : > { %v248_v11 = vld [vmem:[%s5096_s1 + $0x88] sm:$0xff] (!%p191_p9)  ;;  %v245_v14 = vld [vmem:[%s5096_s1 + $0x70] sm:$0xff] (!%p191_p9)  ;;  %v247_v16 = vld [vmem:[%s5096_s1 + $0x80] sm:$0xff] (!%p191_p9)  ;;  %s2848_s11 = sshll.u32 (!%p191_p9), %s215_s10, 6  ;;  %s5046_s23 = scalar_lea.hbm (!%p191_p9), %s5100_s5, %s3077_s13 }
  0x11   : > { %3463 = vmatprep.subr.bf16.mxu0 (!%p191_p9), %v3462_v3  ;;  %3686 = vmatprep.subr.bf16.mxu1 (!%p191_p9), %v3462_v3  ;;  %v3470_v13 = vpack.c.bf16 (!%p191_p9), %v248_v11, %v236_v10  ;;  %v238_v17 = vld [vmem:[%s5096_s1 + $0x38] sm:$0xff] (!%p191_p9)  ;;  %v3468_v19 = vpack.c.bf16 (!%p191_p9), %v245_v14, %v233_v12  ;;  %v3472_v20 = vpack.c.bf16 (!%p191_p9), %v247_v16, %v235_v15  ;;  %v240_v21 = vld [vmem:[%s5096_s1 + $0x48] sm:$0xff] (!%p191_p9)  ;;  %v237_v33 = vld [vmem:[%s5096_s1 + $0x30] sm:$0xff] (!%p191_p9)  ;;  %s5033_s12 = scalar_lea.vmem (!%p191_p9), [#allocation2], %s2848_s11  ;;  %s3923_s26 = smov (!%p191_p9), [#allocation2]  }
  0x12   : > { %3465 = vmatpush1.bf16.msra.mxu0 (!%p191_p9), %v3464_v8  ;;  %3687 = vmatpush1.bf16.msra.mxu1 (!%p191_p9), %v3464_v8  ;;  %v250_v18 = vld [vmem:[%s5096_s1 + $0x98] sm:$0xff] (!%p191_p9)  ;;  %v252_v22 = vld [vmem:[%s5096_s1 + $0xa8] sm:$0xff] (!%p191_p9)  ;;  %v249_v34 = vld [vmem:[%s5096_s1 + $0x90] sm:$0xff] (!%p191_p9)  ;;  %s3861_s30 = sshll.u32 (!%p191_p9), %s3923_s26, 4  ;;  %s3862_s30 = int_to_ptr.vmem [resolvable:$false] %s3861_s30 }
  0x13   : > { %3467 = vmatprep.subr.bf16.mxu1 (!%p191_p9), %v3466_v9  ;;  %3471 = vmatprep.subr.bf16.mxu0 (!%p191_p9), %v3470_v13  ;;  %v3474_v25 = vpack.c.bf16 (!%p191_p9), %v250_v18, %v238_v17  ;;  %v3478_v26 = vpack.c.bf16 (!%p191_p9), %v252_v22, %v240_v21  ;;  %v239_v35 = vld [vmem:[%s5096_s1 + $0x40] sm:$0xff] (!%p191_p9)  ;;  %v242_v37 = vld [vmem:[%s5096_s1 + $0x58] sm:$0xff] (!%p191_p9)  ;;  %v3476_v39 = vpack.c.bf16 (!%p191_p9), %v249_v34, %v237_v33  ;;  %v241_v42 = vld [vmem:[%s5096_s1 + $0x50] sm:$0xff] (!%p191_p9) }
  0x14   : > { %v251_v36 = vld [vmem:[%s5096_s1 + $0xa0] sm:$0xff] (!%p191_p9)  ;;  %v254_v38 = vld [vmem:[%s5096_s1 + $0xb8] sm:$0xff] (!%p191_p9)  ;;  %v253_v43 = vld [vmem:[%s5096_s1 + $0xb0] sm:$0xff] (!%p191_p9) }
  0x15   : > { %s219_s17 = scalar_select %p218_p10, %s3977_s22, 1  ;;  %v3480_v40 = vpack.c.bf16 %v251_v36, %v239_v35  ;;  %v3482_v41 = vpack.c.bf16 %v254_v38, %v242_v37  ;;  %v3484_v44 = vpack.c.bf16 %v253_v43, %v241_v42  ;;  %v4255_v45 = vld [vmem:[%s5097_s2 + $0x60] sm:$0xff] }
  0x16   : > { %s5054_s22 = scalar_lea.sflag [#allocation3], %s215_s10 }
  0x17   : > { %s3076_s14 = sshll.u32 %s219_s17, 6 }
  0x18   : > { %s4053_s6 = scalar_lea.vmem %s5095_s0, %s3076_s14  ;;  %s2782_s14 = sshll.u32 %s5033_s12, 4  ;;  %s5048_s14 = int_to_ptr.vmem [resolvable:$true] %s2782_s14 }
  0x19   : > { %v4062_v23 = vld [vmem:[%s4053_s6] sm:$0xff]  ;;  %v4074_v27 = vld [vmem:[%s4053_s6 + $0x8] sm:$0xff]  ;;  %v4086_v29 = vld [vmem:[%s4053_s6 + $0x10] sm:$0xff]  ;;  %s3857_s25 = scalar_lea.vmem %s5048_s14, 1024  ;;  %p3864_p0 = scmp.lt.s32.totalorder %s5048_s14, %s3862_s30 }
  0x1a   : > { %v4065_v24 = vld [vmem:[%s4053_s6 + $0x20] sm:$0xff]  ;;  %2851 = vmatmul.mubr.msk.f32.vlgmr.msra.gmra.mrb[0].mxu0 %vm255_vm0, %v4062_v23  ;;  %v4077_v28 = vld [vmem:[%s4053_s6 + $0x28] sm:$0xff]  ;;  %v4089_v30 = vld [vmem:[%s4053_s6 + $0x30] sm:$0xff]  ;;  %p3858_p11 = scmp.ne.s32.totalorder %s5048_s14, %s3857_s25 }
  0x1b   : > { %2855 = vmatmul.mubr.msk.f32.vlgmr.msra.gmra.mrb[0].mxu1 %vm255_vm0, %v4065_v24  ;;  %350 = vmatprep.mubr.f32.mxu0 %v3921_v5  ;;  %v4098_v31 = vld [vmem:[%s4053_s6 + $0x18] sm:$0xff] }
  0x1c   : > { %374 = vmatprep.mubr.f32.mxu1 %v3921_v5  ;;  %3469 = vmatpush1.bf16.msra.mxu1 %v3468_v19  ;;  %v4101_v32 = vld [vmem:[%s4053_s6 + $0x38] sm:$0xff]  ;;  %p3859_p12 = pnand %p3858_p11, %p3994_p5  ;;  %s3863_s6 = scalar_lea.vmem %s3862_s30, 2048 }
  0x1d   : > { %3473 = vmatpush1.bf16.msra.mxu0 %v3472_v20  ;;  %3475 = vmatprep.subr.bf16.mxu1 %v3474_v25  ;;  %p3865_p1 = scmp.lt.s32.totalorder %s3863_s6, %s3857_s25 }
  0x1e   : > { %3479 = vmatprep.subr.bf16.mxu0 %v3478_v26  ;;  %2852 = vmatmul.mubr.msk.f32.gmra.mrb[2].mxu0 %vm255_vm0, %v4074_v27  ;;  %p3860_p13 = pneg %p3859_p12 }
  0x1f   : > { %2856 = vmatmul.mubr.msk.f32.gmra.mrb[2].mxu1 %vm255_vm0, %v4077_v28  ;;  %356 = vmatprep.mubr.f32.mxu0 %v3921_v5  ;;  %p3866_p2 = por %p3865_p1, %p3864_p0 }
  0x20   : > { %380 = vmatprep.mubr.f32.mxu1 %v3921_v5 }
  0x21   : > { %p3867_p3 = pnand %p3866_p2, %p3860_p13 }
  0x22   : > { %2853 = vmatmul.mubr.msk.f32.gmra.mrb[4].mxu0 %vm255_vm0, %v4086_v29 }
  0x23   : > { %2857 = vmatmul.mubr.msk.f32.gmra.mrb[4].mxu1 %vm255_vm0, %v4089_v30  ;;  %362 = vmatprep.mubr.f32.mxu0 %v3921_v5 }
  0x24   : > { %386 = vmatprep.mubr.f32.mxu1 %v3921_v5 }
  0x26   : > { %2854 = vmatmul.mubr.msk.f32.gmra.mrb[6].mxu0 %vm255_vm0, %v4098_v31 }
  0x27   : > { %2858 = vmatmul.mubr.msk.f32.gmra.mrb[6].mxu1 %vm255_vm0, %v4101_v32  ;;  %570 = vmatprep.mubr.f32.mxu0 %v3921_v5 }
  0x28   : > { %457 = vmatprep.mubr.f32.mxu1 %v3921_v5 }
  0x2a   : > { %2867 = vmatmul.mubr.msk.f32.vlgmr.msra.gmra.mrb[8].mxu0 %vm255_vm0, %v4062_v23 }
  0x2b   : > { %2859 = vmatmul.mubr.msk.f32.vlgmr.msra.gmra.mrb[8].mxu1 %vm255_vm0, %v4062_v23  ;;  %576 = vmatprep.mubr.f32.mxu0 %v3921_v5 }
  0x2c   : > { %463 = vmatprep.mubr.f32.mxu1 %v3921_v5  ;;  %3477 = vmatpush1.bf16.msra.mxu1 %v3476_v39 }
  0x2d   : > { %3481 = vmatpush1.bf16.msra.mxu0 %v3480_v40  ;;  %3483 = vmatprep.subr.bf16.mxu1 %v3482_v41 }
  0x2e   : > { %2868 = vmatmul.mubr.msk.f32.gmra.mrb[10].mxu0 %vm255_vm0, %v4074_v27 }
  0x2f   : > { %2860 = vmatmul.mubr.msk.f32.gmra.mrb[10].mxu1 %vm255_vm0, %v4074_v27  ;;  %582 = vmatprep.mubr.f32.mxu0 %v3921_v5 }
  0x30   : > { %469 = vmatprep.mubr.f32.mxu1 %v3921_v5 }
  0x32   : > { %2869 = vmatmul.mubr.msk.f32.gmra.mrb[12].mxu0 %vm255_vm0, %v4086_v29 }
  0x33   : > { %2861 = vmatmul.mubr.msk.f32.gmra.mrb[12].mxu1 %vm255_vm0, %v4086_v29  ;;  %588 = vmatprep.mubr.f32.mxu0 %v3921_v5 }
  0x34   : > { %475 = vmatprep.mubr.f32.mxu1 %v3921_v5 }
  0x36   : > { %2870 = vmatmul.mubr.msk.f32.gmra.mrb[14].mxu0 %vm255_vm0, %v4098_v31 }
  0x37   : > { %2862 = vmatmul.mubr.msk.f32.gmra.mrb[14].mxu1 %vm255_vm0, %v4098_v31  ;;  %594 = vmatprep.mubr.f32.mxu0 %v3921_v5 }
  0x38   : > { %481 = vmatprep.mubr.f32.mxu1 %v3921_v5 }
  0x3a   : > { %2871 = vmatmul.mubr.msk.f32.gmra.mrb[16].mxu0 %vm255_vm0, %v4065_v24 }
  0x3b   : > { %2863 = vmatmul.mubr.msk.f32.gmra.mrb[16].mxu1 %vm255_vm0, %v4065_v24  ;;  %600 = vmatprep.mubr.f32.mxu0 %v3921_v5 }
  0x3c   : > { %487 = vmatprep.mubr.f32.mxu1 %v3921_v5 }
  0x3e   : > { %2872 = vmatmul.mubr.msk.f32.gmra.mrb[18].mxu0 %vm255_vm0, %v4077_v28 }
  0x3f   : > { %2864 = vmatmul.mubr.msk.f32.gmra.mrb[18].mxu1 %vm255_vm0, %v4077_v28  ;;  %606 = vmatprep.mubr.f32.mxu0 %v3921_v5 }
  0x40   : > { %493 = vmatprep.mubr.f32.mxu1 %v3921_v5 }
  0x42   : > { %2873 = vmatmul.mubr.msk.f32.gmra.mrb[20].mxu0 %vm255_vm0, %v4089_v30 }
  0x43   : > { %2865 = vmatmul.mubr.msk.f32.gmra.mrb[20].mxu1 %vm255_vm0, %v4089_v30  ;;  %612 = vmatprep.mubr.f32.mxu0 %v3921_v5 }
  0x44   : > { %499 = vmatprep.mubr.f32.mxu1 %v3921_v5 }
  0x46   : > { %2874 = vmatmul.mubr.msk.f32.gmra.mrb[22].mxu0 %vm255_vm0, %v4101_v32 }
  0x47   : > { %2866 = vmatmul.mubr.msk.f32.gmra.mrb[22].mxu1 %vm255_vm0, %v4101_v32  ;;  %796 = vmatprep.mubr.f32.mxu0 %v3921_v5 }
  0x48   : > { %683 = vmatprep.mubr.f32.mxu1 %v3921_v5 }
  0x4a   : > { %2883 = vmatmul.mubr.msk.f32.vlgmr.msra.gmra.mrb[24].mxu0 %vm255_vm0, %v4062_v23 }
  0x4b   : > { %2875 = vmatmul.mubr.msk.f32.vlgmr.msra.gmra.mrb[24].mxu1 %vm255_vm0, %v4062_v23  ;;  %802 = vmatprep.mubr.f32.mxu0 %v3921_v5 }
  0x4c   : > { %689 = vmatprep.mubr.f32.mxu1 %v3921_v5  ;;  %3485 = vmatpush1.bf16.msra.mxu1 %v3484_v44 }
  0x4e   : > { %2884 = vmatmul.mubr.msk.f32.gmra.mrb[26].mxu0 %vm255_vm0, %v4074_v27 }
  0x4f   : > { %2876 = vmatmul.mubr.msk.f32.gmra.mrb[26].mxu1 %vm255_vm0, %v4074_v27  ;;  %808 = vmatprep.mubr.f32.mxu0 %v3921_v5 }
  0x50   : > { %695 = vmatprep.mubr.f32.mxu1 %v3921_v5 }
  0x52   : > { %2885 = vmatmul.mubr.msk.f32.gmra.mrb[28].mxu0 %vm255_vm0, %v4086_v29 }
  0x53   : > { %2877 = vmatmul.mubr.msk.f32.gmra.mrb[28].mxu1 %vm255_vm0, %v4086_v29  ;;  %814 = vmatprep.mubr.f32.mxu0 %v3921_v5 }
  0x54   : > { %701 = vmatprep.mubr.f32.mxu1 %v3921_v5 }
  0x56   : > { %2886 = vmatmul.mubr.msk.f32.gmra.mrb[30].mxu0 %vm255_vm0, %v4098_v31 }
  0x57   : > { %2878 = vmatmul.mubr.msk.f32.gmra.mrb[30].mxu1 %vm255_vm0, %v4098_v31  ;;  %820 = vmatprep.mubr.f32.mxu0 %v3921_v5 }
  0x58   : > { %707 = vmatprep.mubr.f32.mxu1 %v3921_v5 }
  0x5a   : > { %2887 = vmatmul.mubr.msk.f32.gmra.mrb[32].mxu0 %vm255_vm0, %v4065_v24 }
  0x5b   : > { %2879 = vmatmul.mubr.msk.f32.gmra.mrb[32].mxu1 %vm255_vm0, %v4065_v24  ;;  %826 = vmatprep.mubr.f32.mxu0 %v3921_v5 }
  0x5c   : > { %713 = vmatprep.mubr.f32.mxu1 %v3921_v5 }
  0x5e   : > { %2888 = vmatmul.mubr.msk.f32.gmra.mrb[34].mxu0 %vm255_vm0, %v4077_v28 }
  0x5f   : > { %2880 = vmatmul.mubr.msk.f32.gmra.mrb[34].mxu1 %vm255_vm0, %v4077_v28  ;;  %832 = vmatprep.mubr.f32.mxu0 %v3921_v5 }
  0x60   : > { %719 = vmatprep.mubr.f32.mxu1 %v3921_v5 }
  0x62   : > { %2889 = vmatmul.mubr.msk.f32.gmra.mrb[36].mxu0 %vm255_vm0, %v4089_v30 }
  0x63   : > { %2881 = vmatmul.mubr.msk.f32.gmra.mrb[36].mxu1 %vm255_vm0, %v4089_v30  ;;  %838 = vmatprep.mubr.f32.mxu0 %v3921_v5 }
  0x64   : > { %725 = vmatprep.mubr.f32.mxu1 %v3921_v5 }
  0x66   : > { %2890 = vmatmul.mubr.msk.f32.gmra.mrb[38].mxu0 %vm255_vm0, %v4101_v32 }
  0x67   : > { %2882 = vmatmul.mubr.msk.f32.gmra.mrb[38].mxu1 %vm255_vm0, %v4101_v32  ;;  %1084 = vmatprep.mubr.f32.mxu0 %v3921_v5 }
  0x68   : > { %909 = vmatprep.mubr.f32.mxu1 %v3921_v5 }
  0x6b   : > { %2891 = vmatmul.mubr.msk.f32.vlgmr.msra.gmra.mrb[40].mxu1 %vm255_vm0, %v4062_v23 }
  0x6c   : > { %915 = vmatprep.mubr.f32.mxu1 %v3921_v5 }
  0x6f   : > { %2892 = vmatmul.mubr.msk.f32.gmra.mrb[42].mxu1 %vm255_vm0, %v4074_v27 }
  0x70   : > { %921 = vmatprep.mubr.f32.mxu1 %v3921_v5 }
  0x73   : > { %2893 = vmatmul.mubr.msk.f32.gmra.mrb[44].mxu1 %vm255_vm0, %v4086_v29 }
  0x74   : > { %927 = vmatprep.mubr.f32.mxu1 %v3921_v5 }
  0x77   : > { %2894 = vmatmul.mubr.msk.f32.gmra.mrb[46].mxu1 %vm255_vm0, %v4098_v31 }
  0x78   : > { %933 = vmatprep.mubr.f32.mxu1 %v3921_v5 }
  0x7b   : > { %2895 = vmatmul.mubr.msk.f32.gmra.mrb[48].mxu1 %vm255_vm0, %v4065_v24 }
  0x7c   : > { %939 = vmatprep.mubr.f32.mxu1 %v3921_v5 }
  0x7f   : > { %2896 = vmatmul.mubr.msk.f32.gmra.mrb[50].mxu1 %vm255_vm0, %v4077_v28 }
  0x80   : > { %945 = vmatprep.mubr.f32.mxu1 %v3921_v5 }
  0x83   : > { %2897 = vmatmul.mubr.msk.f32.gmra.mrb[52].mxu1 %vm255_vm0, %v4089_v30 }
  0x84   : > { %951 = vmatprep.mubr.f32.mxu1 %v3921_v5 }
  0x87   : > { %2898 = vmatmul.mubr.msk.f32.gmra.mrb[54].mxu1 %vm255_vm0, %v4101_v32 }
  0x88   : > { %3234 = vmatprep.mubr.msk.f32.mxu1 %vm983_vm1, %v4255_v45 }
  0xed   : > { %v4259_v46 = vpop.f32.mrb[0].mxu0 }
  0xee   : > { %v4261_v47 = vpop.f32.mrb[0].mxu1  ;;  %v4263_v48 = vpop.f32.mrb[1].mxu0 }
  0xef   : > { %v4265_v49 = vpop.f32.mrb[1].mxu1 }
  0xf1   : > { %v4267_v50 = vpop.f32.mrb[2].mxu0 }
  0xf2   : > { %v4269_v51 = vpop.f32.mrb[2].mxu1  ;;  %v3520_v52 = vpack.c.bf16 %v4267_v50, %v4259_v46  ;;  %v4275_v54 = vpop.f32.mrb[3].mxu0  ;;  %v2901_v46 = vld [vmem:[%s5097_s2 + $0x70] sm:$0xff] }
  0xf3   : > { %v3528_v53 = vpack.c.bf16 %v4269_v51, %v4261_v47  ;;  %v4277_v55 = vpop.f32.mrb[3].mxu1  ;;  %v3518_v56 = vpack.c.bf16 %v4275_v54, %v4263_v48 }
  0xf4   : > { %v3526_v57 = vpack.c.bf16 %v4277_v55, %v4265_v49 }
  0xf5   : > { %v4283_v58 = vpop.f32.mrb[4].mxu0 }
  0xf6   : > { %v4285_v59 = vpop.f32.mrb[4].mxu1  ;;  %v4287_v60 = vpop.f32.mrb[5].mxu0 }
  0xf7   : > { %v4289_v61 = vpop.f32.mrb[5].mxu1 }
  0xf9   : > { %v4291_v62 = vpop.f32.mrb[6].mxu0 }
  0xfa   : > { %v4293_v63 = vpop.f32.mrb[6].mxu1  ;;  %v3524_v0 = vpack.c.bf16 %v4291_v62, %v4283_v58  ;;  %v4299_v2 = vpop.f32.mrb[7].mxu0  ;;  %v2903_v58 = vld [vmem:[%s5097_s2 + $0x80] sm:$0xff] }
  0xfb   : > { %v3532_v1 = vpack.c.bf16 %v4293_v63, %v4285_v59  ;;  %v4301_v3 = vpop.f32.mrb[7].mxu1  ;;  %v3522_v4 = vpack.c.bf16 %v4299_v2, %v4287_v60  ;;  %v2907_v59 = vld [vmem:[%s5097_s2 + $0xa0] sm:$0xff] }
  0xfc   : > { %v3530_v6 = vpack.c.bf16 %v4301_v3, %v4289_v61  ;;  %v2905_v61 = vld [vmem:[%s5097_s2 + $0x90] sm:$0xff] }
  0xfd   : > { %v572_v8 = vpop.f32.mrb[8].mxu0 }
  0xfe   : > { %v459_v7 = vpop.f32.mrb[8].mxu1  ;;  %v574_v10 = vpop.f32.mrb[9].mxu0 }
  0xff   : > { %v461_v9 = vpop.f32.mrb[9].mxu1 }
 0x101   : > { %v578_v12 = vpop.f32.mrb[10].mxu0 }
 0x102   : > { %v465_v11 = vpop.f32.mrb[10].mxu1  ;;  %v3486_v14 = vpack.c.bf16 %v578_v12, %v572_v8  ;;  %v580_v16 = vpop.f32.mrb[11].mxu0 }
 0x103   : > { %v4307_v13 = vpack.c.bf16 %v465_v11, %v459_v7  ;;  %v467_v15 = vpop.f32.mrb[11].mxu1  ;;  %v3502_v18 = vpack.c.bf16 %v580_v16, %v574_v10 }
 0x104   : > { %v3488_v17 = vpack.c.bf16 %v467_v15, %v461_v9  ;;  %3487 = vmatprep.subr.bf16.mxu0 %v3486_v14 }
 0x105   : > { %v584_v20 = vpop.f32.mrb[12].mxu0  ;;  %3503 = vmatprep.subr.bf16.mxu1 %v3502_v18 }
 0x106   : > { %v471_v19 = vpop.f32.mrb[12].mxu1  ;;  %3489 = vmatpush1.bf16.msra.mxu0 %v3488_v17  ;;  %v586_v22 = vpop.f32.mrb[13].mxu0  ;;  %3505 = vmatpush3.bf16.msra.mxu1 %v3502_v18 }
 0x107   : > { %v473_v21 = vpop.f32.mrb[13].mxu1 }
 0x109   : > { %v590_v24 = vpop.f32.mrb[14].mxu0 }
 0x10a   : > { %v477_v23 = vpop.f32.mrb[14].mxu1  ;;  %v3490_v26 = vpack.c.bf16 %v590_v24, %v584_v20  ;;  %v592_v28 = vpop.f32.mrb[15].mxu0  ;;  %v2900_v20 = vld [vmem:[%s5097_s2 + $0x68] sm:$0xff] }
 0x10b   : > { %v4309_v25 = vpack.c.bf16 %v477_v23, %v471_v19  ;;  %v479_v27 = vpop.f32.mrb[15].mxu1  ;;  %v3506_v30 = vpack.c.bf16 %v592_v28, %v586_v22 }
 0x10c   : > { %v3492_v29 = vpack.c.bf16 %v479_v27, %v473_v21  ;;  %3491 = vmatprep.subr.bf16.mxu0 %v3490_v26  ;;  %v2906_v27 = vld [vmem:[%s5097_s2 + $0x98] sm:$0xff] }
 0x10d   : > { %v596_v32 = vpop.f32.mrb[16].mxu0  ;;  %3507 = vmatprep.subr.bf16.mxu1 %v3506_v30 }
 0x10e   : > { %v483_v31 = vpop.f32.mrb[16].mxu1  ;;  %3493 = vmatpush1.bf16.msra.mxu0 %v3492_v29  ;;  %v598_v34 = vpop.f32.mrb[17].mxu0  ;;  %3509 = vmatpush3.bf16.msra.mxu1 %v3506_v30  ;;  %v2908_v30 = vld [vmem:[%s5097_s2 + $0xa8] sm:$0xff] }
 0x10f   : > { %v485_v33 = vpop.f32.mrb[17].mxu1 }
 0x111   : > { %v602_v36 = vpop.f32.mrb[18].mxu0 }
 0x112   : > { %v489_v35 = vpop.f32.mrb[18].mxu1  ;;  %v3494_v38 = vpack.c.bf16 %v602_v36, %v596_v32  ;;  %v604_v40 = vpop.f32.mrb[19].mxu0 }
 0x113   : > { %v4311_v37 = vpack.c.bf16 %v489_v35, %v483_v31  ;;  %v491_v39 = vpop.f32.mrb[19].mxu1  ;;  %v3510_v42 = vpack.c.bf16 %v604_v40, %v598_v34  ;;  %v2909_v35 = vld [vmem:[%s5097_s2 + $0xb0] sm:$0xff]  ;;  %v4458_v40 = vld [vmem:[%s5097_s2 + $0xb8] sm:$0xff] }
 0x114   : > { %v3496_v41 = vpack.c.bf16 %v491_v39, %v485_v33  ;;  %3495 = vmatprep.subr.bf16.mxu0 %v3494_v38 }
 0x115   : > { %v608_v44 = vpop.f32.mrb[20].mxu0  ;;  %3511 = vmatprep.subr.bf16.mxu1 %v3510_v42 }
 0x116   : > { %v495_v43 = vpop.f32.mrb[20].mxu1  ;;  %3497 = vmatpush1.bf16.msra.mxu0 %v3496_v41  ;;  %v610_v8 = vpop.f32.mrb[21].mxu0  ;;  %3513 = vmatpush3.bf16.msra.mxu1 %v3510_v42 }
 0x117   : > { %v497_v7 = vpop.f32.mrb[21].mxu1 }
 0x119   : > { %v614_v10 = vpop.f32.mrb[22].mxu0 }
 0x11a   : > { %v501_v9 = vpop.f32.mrb[22].mxu1  ;;  %v3498_v12 = vpack.c.bf16 %v614_v10, %v608_v44  ;;  %v616_v15 = vpop.f32.mrb[23].mxu0 }
 0x11b   : > { %v4313_v11 = vpack.c.bf16 %v501_v9, %v495_v43  ;;  %v503_v14 = vpop.f32.mrb[23].mxu1  ;;  %v3514_v17 = vpack.c.bf16 %v616_v15, %v610_v8  ;;  %v4467_v43 = vld [vmem:[%s5097_s2] sm:$0xff]  ;;  %v4480_v8 = vld [vmem:[%s5097_s2 + $0x8] sm:$0xff] }
 0x11c   : > { %v3500_v16 = vpack.c.bf16 %v503_v14, %v497_v7  ;;  %3499 = vmatprep.subr.bf16.mxu0 %v3498_v12  ;;  %v4491_v14 = vld [vmem:[%s5097_s2 + $0x10] sm:$0xff] }
 0x11d   : > { %3515 = vmatprep.subr.bf16.mxu1 %v3514_v17  ;;  %v798_v19 = vpop.f32.mrb[24].mxu0 }
 0x11e   : > { %3501 = vmatpush1.bf16.msra.mxu0 %v3500_v16  ;;  %v4315_v18 = vpop.f32.mrb[24].mxu1  ;;  %3517 = vmatpush3.bf16.msra.mxu1 %v3514_v17  ;;  %v4323_v22 = vpop.f32.mrb[25].mxu0 }
 0x11f   : > { %3519 = vmatprep.subr.bf16.mxu0 %v3518_v56  ;;  %v687_v21 = vpop.f32.mrb[25].mxu1  ;;  %3535 = vmatprep.subr.bf16.mxu1 %v4307_v13 }
 0x121   : > { %2911 = vmatmul.mubr.msk.f32.vlgmr.msra.gmra.mrb[40].mxu0 %vm983_vm1, %v4255_v45  ;;  %3235 = vmatmul.mubr.msk.f32.vlgmr.msra.gmra.mrb[56].mxu1 %vm983_vm1, %v2900_v20  ;;  %v804_v54 = vpop.f32.mrb[26].mxu0 }
 0x122   : > { %3521 = vmatpush1.bf16.msra.mxu0 %v3520_v52  ;;  %v4332_v48 = vpop.f32.mrb[26].mxu1  ;;  %3537 = vmatpush3.bf16.msra.mxu1 %v4307_v13  ;;  %v4340_v45 = vpack.c.bf16 %v804_v54, %v798_v19  ;;  %v4342_v24 = vpop.f32.mrb[27].mxu0  ;;  %v4509_v19 = vld [vmem:[%s5097_s2 + $0x18] sm:$0xff] }
 0x123   : > { %3523 = vmatprep.subr.bf16.mxu0 %v3522_v4  ;;  %v3552_v56 = vpack.c.bf16 %v4332_v48, %v4315_v18  ;;  %v693_v23 = vpop.f32.mrb[27].mxu1  ;;  %1090 = vmatprep.mubr.f32.mxu0 %v3921_v5  ;;  %v3584_v52 = vpack.c.bf16 %v4342_v24, %v4323_v22  ;;  %v2902_v4 = vld [vmem:[%s5097_s2 + $0x78] sm:$0xff]  ;;  %v3031_v22 = vld [vmem:[%s5098_s3 + $0x40] sm:$0xff] }
 0x124   : > { %3539 = vmatprep.subr.bf16.mxu1 %v4309_v25  ;;  %v3550_v50 = vpack.c.bf16 %v693_v23, %v687_v21  ;;  %3237 = vmatprep.mubr.msk.f32.mxu1 %vm983_vm1, %v2901_v46  ;;  %v4515_v21 = vld [vmem:[%s5097_s2 + $0x20] sm:$0xff]  ;;  %v4529_v23 = vld [vmem:[%s5097_s2 + $0x28] sm:$0xff] }
 0x125   : > { %2912 = vmatmul.mubr.msk.f32.gmra.mrb[42].mxu0 %vm983_vm1, %v2900_v20  ;;  %v810_v2 = vpop.f32.mrb[28].mxu0  ;;  %3238 = vmatmul.mubr.msk.f32.gmra.mrb[58].mxu1 %vm983_vm1, %v2902_v4 }
 0x126   : > { %3525 = vmatpush1.bf16.msra.mxu0 %v3524_v0  ;;  %1096 = vmatprep.mubr.f32.mxu0 %v3921_v5  ;;  %v4357_v60 = vpop.f32.mrb[28].mxu1  ;;  %v4368_v26 = vpop.f32.mrb[29].mxu0 }
 0x127   : > { %3527 = vmatprep.subr.bf16.mxu0 %v3526_v57  ;;  %3541 = vmatpush3.bf16.msra.mxu1 %v4309_v25  ;;  %v4366_v13 = vpop.f32.mrb[29].mxu1  ;;  %v2904_v57 = vld [vmem:[%s5097_s2 + $0x88] sm:$0xff] }
 0x128   : > { %3543 = vmatprep.subr.bf16.mxu1 %v4311_v37  ;;  %3240 = vmatprep.mubr.msk.f32.mxu1 %vm983_vm1, %v2903_v58 }
 0x129   : > { %2913 = vmatmul.mubr.msk.f32.gmra.mrb[44].mxu0 %vm983_vm1, %v2901_v46  ;;  %v816_v55 = vpop.f32.mrb[30].mxu0  ;;  %3241 = vmatmul.mubr.msk.f32.gmra.mrb[60].mxu1 %vm983_vm1, %v2904_v57 }
 0x12a   : > { %3529 = vmatpush1.bf16.msra.mxu0 %v3528_v53  ;;  %1102 = vmatprep.mubr.f32.mxu0 %v3921_v5  ;;  %v4381_v49 = vpop.f32.mrb[30].mxu1  ;;  %v4394_v51 = vpack.c.bf16 %v816_v55, %v810_v2  ;;  %v4396_v53 = vpop.f32.mrb[31].mxu0 }
 0x12b   : > { %3531 = vmatprep.subr.bf16.mxu0 %v3530_v6  ;;  %3545 = vmatpush3.bf16.msra.mxu1 %v4311_v37  ;;  %v3556_v62 = vpack.c.bf16 %v4381_v49, %v4357_v60  ;;  %v4392_v47 = vpop.f32.mrb[31].mxu1  ;;  %v3588_v3 = vpack.c.bf16 %v4396_v53, %v4368_v26  ;;  %v4651_v49 = vld [vmem:[%s5097_s2 + $0xd8] sm:$0xff] }
 0x12c   : > { %3547 = vmatprep.subr.bf16.mxu1 %v4313_v11  ;;  %v3554_v0 = vpack.c.bf16 %v4392_v47, %v4366_v13  ;;  %3243 = vmatprep.mubr.msk.f32.mxu1 %vm983_vm1, %v2905_v61 }
 0x12d   : > { %2914 = vmatmul.mubr.msk.f32.gmra.mrb[46].mxu0 %vm983_vm1, %v2902_v4  ;;  %v822_v25 = vpop.f32.mrb[32].mxu0  ;;  %3244 = vmatmul.mubr.msk.f32.gmra.mrb[62].mxu1 %vm983_vm1, %v2906_v27 }
 0x12e   : > { %3533 = vmatpush1.bf16.msra.mxu0 %v3532_v1  ;;  %1108 = vmatprep.mubr.f32.mxu0 %v3921_v5  ;;  %v4413_v6 = vpop.f32.mrb[32].mxu1  ;;  %v4421_v29 = vpop.f32.mrb[33].mxu0 }
 0x12f   : > { %3549 = vmatpush3.bf16.msra.mxu1 %v4313_v11  ;;  %3551 = vmatprep.subr.bf16.mxu0 %v3550_v50  ;;  %v4419_v28 = vpop.f32.mrb[33].mxu1  ;;  %v4536_v50 = vld [vmem:[%s5097_s2 + $0x30] sm:$0xff] }
 0x130   : > { %3567 = vmatprep.subr.bf16.mxu1 %v4340_v45  ;;  %3246 = vmatprep.mubr.msk.f32.mxu1 %vm983_vm1, %v2907_v59 }
 0x131   : > { %2915 = vmatmul.mubr.msk.f32.gmra.mrb[48].mxu0 %vm983_vm1, %v2903_v58  ;;  %v828_v1 = vpop.f32.mrb[34].mxu0  ;;  %3247 = vmatmul.mubr.msk.f32.gmra.mrb[64].mxu1 %vm983_vm1, %v2908_v30  ;;  %v4549_v58 = vld [vmem:[%s5097_s2 + $0x38] sm:$0xff] }
 0x132   : > { %1114 = vmatprep.mubr.f32.mxu0 %v3921_v5  ;;  %v4431_v63 = vpop.f32.mrb[34].mxu1  ;;  %v3574_v33 = vpack.c.bf16 %v828_v1, %v822_v25  ;;  %v4440_v34 = vpop.f32.mrb[35].mxu0  ;;  %3249 = vmatprep.mubr.msk.f32.mxu1 %vm983_vm1, %v2909_v35 }
 0x133   : > { %v3560_v31 = vpack.c.bf16 %v4431_v63, %v4413_v6  ;;  %v4438_v32 = vpop.f32.mrb[35].mxu1  ;;  %v3592_v37 = vpack.c.bf16 %v4440_v34, %v4421_v29  ;;  %v4666_v6 = vld [vmem:[%s5097_s2 + $0xe0] sm:$0xff]  ;;  %v4685_v63 = vld [vmem:[%s5097_s2 + $0xf0] sm:$0xff] }
 0x134   : > { %v3558_v36 = vpack.c.bf16 %v4438_v32, %v4419_v28  ;;  %v4674_v28 = vld [vmem:[%s5097_s2 + $0xe8] sm:$0xff]  ;;  %v4698_v32 = vld [vmem:[%s5097_s2 + $0x100] sm:$0xff] }
 0x135   : > { %2916 = vmatmul.mubr.msk.f32.gmra.mrb[50].mxu0 %vm983_vm1, %v2904_v57  ;;  %v834_v39 = vpop.f32.mrb[36].mxu0  ;;  %3250 = vmatmul.mubr.msk.f32.gmra.mrb[66].mxu1 %vm983_vm1, %v4458_v40  ;;  %v4554_v57 = vld [vmem:[%s5097_s2 + $0x40] sm:$0xff] }
 0x136   : > { %1120 = vmatprep.mubr.f32.mxu0 %v3921_v5  ;;  %v4453_v38 = vpop.f32.mrb[36].mxu1  ;;  %v4462_v42 = vpop.f32.mrb[37].mxu0  ;;  %3268 = vmatprep.mubr.msk.f32.mxu1 %vm983_vm1, %v4467_v43 }
 0x137   : > { %v4460_v41 = vpop.f32.mrb[37].mxu1 }
 0x139   : > { %2917 = vmatmul.mubr.msk.f32.gmra.mrb[52].mxu0 %vm983_vm1, %v2905_v61  ;;  %v840_v7 = vpop.f32.mrb[38].mxu0  ;;  %3269 = vmatmul.mubr.msk.f32.vlgmr.msra.gmra.mrb[56].mxu1 %vm983_vm1, %v4480_v8  ;;  %v4567_v61 = vld [vmem:[%s5097_s2 + $0x48] sm:$0xff] }
 0x13a   : > { %1126 = vmatprep.mubr.f32.mxu0 %v3921_v5  ;;  %v4475_v44 = vpop.f32.mrb[38].mxu1  ;;  %v3578_v11 = vpack.c.bf16 %v840_v7, %v834_v39  ;;  %v4486_v12 = vpop.f32.mrb[39].mxu0  ;;  %3271 = vmatprep.mubr.msk.f32.mxu1 %vm983_vm1, %v4491_v14  ;;  %v4595_v39 = vld [vmem:[%s5097_s2 + $0xc0] sm:$0xff]  ;;  %v4613_v7 = vld [vmem:[%s5097_s2 + $0xc8] sm:$0xff] }
 0x13b   : > { %v3564_v9 = vpack.c.bf16 %v4475_v44, %v4453_v38  ;;  %v4484_v10 = vpop.f32.mrb[39].mxu1  ;;  %v3596_v16 = vpack.c.bf16 %v4486_v12, %v4462_v42  ;;  %3569 = vmatpush3.bf16.msra.mxu1 %v4340_v45  ;;  %v4715_v38 = vld [vmem:[%s5097_s2 + $0x110] sm:$0xff]  ;;  %v4732_v44 = vld [vmem:[%s5097_s2 + $0x120] sm:$0xff] }
 0x13c   : > { %v3562_v15 = vpack.c.bf16 %v4484_v10, %v4460_v41  ;;  %3571 = vmatprep.subr.bf16.mxu1 %v4394_v51  ;;  %v4724_v41 = vld [vmem:[%s5097_s2 + $0x118] sm:$0xff] }
 0x13d   : > { %2918 = vmatmul.mubr.msk.f32.gmra.mrb[54].mxu0 %vm983_vm1, %v2906_v27  ;;  %3272 = vmatmul.mubr.msk.f32.gmra.mrb[58].mxu1 %vm983_vm1, %v4509_v19  ;;  %v2998_v10 = vld [vmem:[%s5097_s2 + $0x138] sm:$0xff] }
 0x13e   : > { %1132 = vmatprep.mubr.f32.mxu0 %v3921_v5  ;;  %v4504_v17 = vpop.f32.mrb[40].mxu1  ;;  %3274 = vmatprep.mubr.msk.f32.mxu1 %vm983_vm1, %v4515_v21 }
 0x13f   : > { %v913_v20 = vpop.f32.mrb[41].mxu1  ;;  %3573 = vmatpush3.bf16.msra.mxu1 %v4394_v51 }
 0x140   : > { %3575 = vmatprep.subr.bf16.mxu1 %v3574_v33 }
 0x141   : > { %2919 = vmatmul.mubr.msk.f32.gmra.mrb[56].mxu0 %vm983_vm1, %v2907_v59  ;;  %3275 = vmatmul.mubr.msk.f32.gmra.mrb[60].mxu1 %vm983_vm1, %v4529_v23  ;;  %v4574_v59 = vld [vmem:[%s5097_s2 + $0x50] sm:$0xff] }
 0x142   : > { %1138 = vmatprep.mubr.f32.mxu0 %v3921_v5  ;;  %v4524_v54 = vpop.f32.mrb[42].mxu1  ;;  %3277 = vmatprep.mubr.msk.f32.mxu1 %vm983_vm1, %v4536_v50 }
 0x143   : > { %v3582_v45 = vpack.c.bf16 %v4524_v54, %v4504_v17  ;;  %v919_v46 = vpop.f32.mrb[43].mxu1  ;;  %3577 = vmatpush3.bf16.msra.mxu1 %v3574_v33  ;;  %v4588_v33 = vld [vmem:[%s5097_s2 + $0x58] sm:$0xff]  ;;  %v3001_v17 = vld [vmem:[%s5097_s2 + $0x150] sm:$0xff] }
 0x144   : > { %v3598_v2 = vpack.c.bf16 %v919_v46, %v913_v20  ;;  %3579 = vmatprep.subr.bf16.mxu1 %v3578_v11  ;;  %v3003_v20 = vld [vmem:[%s5097_s2 + $0x160] sm:$0xff]  ;;  %v3005_v54 = vld [vmem:[%s5097_s2 + $0x170] sm:$0xff] }
 0x145   : > { %2920 = vmatmul.mubr.msk.f32.gmra.mrb[58].mxu0 %vm983_vm1, %v2908_v30  ;;  %3278 = vmatmul.mubr.msk.f32.gmra.mrb[62].mxu1 %vm983_vm1, %v4549_v58 }
 0x146   : > { %1144 = vmatprep.mubr.f32.mxu0 %v3921_v5  ;;  %v4544_v4 = vpop.f32.mrb[44].mxu1  ;;  %3280 = vmatprep.mubr.msk.f32.mxu1 %vm983_vm1, %v4554_v57 }
 0x147   : > { %v925_v55 = vpop.f32.mrb[45].mxu1  ;;  %3581 = vmatpush3.bf16.msra.mxu1 %v3578_v11 }
 0x148   : > { %3599 = vmatprep.subr.bf16.mxu1 %v3598_v2 }
 0x149   : > { %2921 = vmatmul.mubr.msk.f32.gmra.mrb[60].mxu0 %vm983_vm1, %v2909_v35  ;;  %3281 = vmatmul.mubr.msk.f32.gmra.mrb[64].mxu1 %vm983_vm1, %v4567_v61 }
 0x14a   : > { %1150 = vmatprep.mubr.f32.mxu0 %v3921_v5  ;;  %v4562_v51 = vpop.f32.mrb[46].mxu1  ;;  %3283 = vmatprep.mubr.msk.f32.mxu1 %vm983_vm1, %v4574_v59 }
 0x14b   : > { %v3586_v25 = vpack.c.bf16 %v4562_v51, %v4544_v4  ;;  %v931_v27 = vpop.f32.mrb[47].mxu1  ;;  %v3922_v51 = vmov 0  }
 0x14c   : > { %v3602_v1 = vpack.c.bf16 %v931_v27, %v925_v55  ;;  %v2698_v55 = vld [vmem:[%s5099_s4 + $0x10] sm:$0xff]  ;;  %3856 = vset.pattern.permute.xlu1 %v3922_v51  ;;  %3855 = vset.pattern.permute.xlu0 %v3922_v51  ;;  %v2701_v27 = vld [vmem:[%s5099_s4 + $0x28] sm:$0xff] }
 0x14d   : > { %2922 = vmatmul.mubr.msk.f32.gmra.mrb[62].mxu0 %vm983_vm1, %v4458_v40  ;;  %3284 = vmatmul.mubr.msk.f32.gmra.mrb[66].mxu1 %vm983_vm1, %v4588_v33  ;;  %v3061_v51 = vld [vmem:[%s5098_s3 + $0xb0] sm:$0xff] }
 0x14e   : > { %1382 = vmatprep.mubr.f32.mxu0 %v3921_v5  ;;  %v4583_v30 = vpop.f32.mrb[48].mxu1  ;;  %3302 = vmatprep.mubr.msk.f32.mxu1 %vm983_vm1, %v4595_v39 }
 0x14f   : > { %v937_v35 = vpop.f32.mrb[49].mxu1  ;;  %2716 = vperm.xlu1 %3856, %v2698_v55   ;;  %v3055_v55 = vld [vmem:[%s5098_s3 + $0x80] sm:$0xff] }
 0x151   : > { %2935 = vmatmul.mubr.msk.f32.vlgmr.msra.gmra.mrb[40].mxu0 %vm983_vm1, %v4467_v43  ;;  %3303 = vmatmul.mubr.msk.f32.vlgmr.msra.gmra.mrb[56].mxu1 %vm983_vm1, %v4613_v7 }
 0x152   : > { %3553 = vmatpush1.bf16.msra.mxu0 %v3552_v56  ;;  %1388 = vmatprep.mubr.f32.mxu0 %v3921_v5  ;;  %v4605_v40 = vpop.f32.mrb[50].mxu1  ;;  %v4633_v56 = vld [vmem:[%s5097_s2 + $0xd0] sm:$0xff] }
 0x153   : > { %3555 = vmatprep.subr.bf16.mxu0 %v3554_v0  ;;  %v3590_v43 = vpack.c.bf16 %v4605_v40, %v4583_v30  ;;  %v943_v11 = vpop.f32.mrb[51].mxu1  ;;  %3601 = vmatpush3.bf16.msra.mxu1 %v3598_v2  ;;  %v2702_v30 = vld [vmem:[%s5099_s4 + $0x30] sm:$0xff] }
 0x154   : > { %v3606_v18 = vpack.c.bf16 %v943_v11, %v937_v35  ;;  %3603 = vmatprep.subr.bf16.mxu1 %v3602_v1  ;;  %3305 = vmatprep.mubr.msk.f32.mxu1 %vm983_vm1, %v4633_v56 }
 0x155   : > { %2936 = vmatmul.mubr.msk.f32.gmra.mrb[42].mxu0 %vm983_vm1, %v4480_v8  ;;  %3306 = vmatmul.mubr.msk.f32.gmra.mrb[58].mxu1 %vm983_vm1, %v4651_v49  ;;  %v4743_v8 = vld [vmem:[%s5097_s2 + $0x128] sm:$0xff] }
 0x156   : > { %1394 = vmatprep.mubr.f32.mxu0 %v3921_v5  ;;  %3557 = vmatpush1.bf16.msra.mxu0 %v3556_v62  ;;  %v4625_v48 = vpop.f32.mrb[52].mxu1 }
 0x157   : > { %3559 = vmatprep.subr.bf16.mxu0 %v3558_v36  ;;  %v949_v13 = vpop.f32.mrb[53].mxu1  ;;  %3605 = vmatpush3.bf16.msra.mxu1 %v3602_v1  ;;  %v4710_v36 = vld [vmem:[%s5097_s2 + $0x108] sm:$0xff]  ;;  %v2703_v1 = vld [vmem:[%s5099_s4 + $0x38] sm:$0xff] }
 0x158   : > { %3607 = vmatprep.subr.bf16.mxu1 %v3606_v18  ;;  %3308 = vmatprep.mubr.msk.f32.mxu1 %vm983_vm1, %v4666_v6 }
 0x159   : > { %2937 = vmatmul.mubr.msk.f32.gmra.mrb[44].mxu0 %vm983_vm1, %v4491_v14  ;;  %3309 = vmatmul.mubr.msk.f32.gmra.mrb[60].mxu1 %vm983_vm1, %v4674_v28  ;;  %v2999_v14 = vld [vmem:[%s5097_s2 + $0x140] sm:$0xff] }
 0x15a   : > { %1400 = vmatprep.mubr.f32.mxu0 %v3921_v5  ;;  %3561 = vmatpush1.bf16.msra.mxu0 %v3560_v31  ;;  %v4643_v60 = vpop.f32.mrb[54].mxu1  ;;  %v4693_v31 = vld [vmem:[%s5097_s2 + $0xf8] sm:$0xff] }
 0x15b   : > { %3563 = vmatprep.subr.bf16.mxu0 %v3562_v15  ;;  %v3594_v62 = vpack.c.bf16 %v4643_v60, %v4625_v48  ;;  %v955_v47 = vpop.f32.mrb[55].mxu1  ;;  %3609 = vmatpush3.bf16.msra.mxu1 %v3606_v18  ;;  %v3000_v15 = vld [vmem:[%s5097_s2 + $0x148] sm:$0xff] }
 0x15c   : > { %v3610_v0 = vpack.c.bf16 %v955_v47, %v949_v13  ;;  %3311 = vmatprep.mubr.msk.f32.mxu1 %vm983_vm1, %v4685_v63 }
 0x15d   : > { %2938 = vmatmul.mubr.msk.f32.gmra.mrb[46].mxu0 %vm983_vm1, %v4509_v19  ;;  %3312 = vmatmul.mubr.msk.f32.gmra.mrb[62].mxu1 %vm983_vm1, %v4693_v31  ;;  %v3002_v19 = vld [vmem:[%s5097_s2 + $0x158] sm:$0xff] }
 0x15e   : > { %1406 = vmatprep.mubr.f32.mxu0 %v3921_v5  ;;  %3565 = vmatpush1.bf16.msra.mxu0 %v3564_v9  ;;  %v4749_v9 = vld [vmem:[%s5097_s2 + $0x130] sm:$0xff] }
 0x15f   : > { %3583 = vmatprep.subr.bf16.mxu0 %v3582_v45  ;;  %3611 = vmatprep.subr.bf16.mxu1 %v3610_v0 }
 0x160   : > { %3613 = vmatpush3.bf16.msra.mxu1 %v3610_v0  ;;  %3314 = vmatprep.mubr.msk.f32.mxu1 %vm983_vm1, %v4698_v32 }
 0x161   : > { %2939 = vmatmul.mubr.msk.f32.gmra.mrb[48].mxu0 %vm983_vm1, %v4515_v21  ;;  %3315 = vmatmul.mubr.msk.f32.gmra.mrb[64].mxu1 %vm983_vm1, %v4710_v36  ;;  %v3004_v21 = vld [vmem:[%s5097_s2 + $0x168] sm:$0xff] }
 0x162   : > { %1412 = vmatprep.mubr.f32.mxu0 %v3921_v5  ;;  %3317 = vmatprep.mubr.msk.f32.mxu1 %vm983_vm1, %v4715_v38 }
 0x165   : > { %2940 = vmatmul.mubr.msk.f32.gmra.mrb[50].mxu0 %vm983_vm1, %v4529_v23  ;;  %3318 = vmatmul.mubr.msk.f32.gmra.mrb[66].mxu1 %vm983_vm1, %v4724_v41  ;;  %v3006_v23 = vld [vmem:[%s5097_s2 + $0x178] sm:$0xff] }
 0x166   : > { %1418 = vmatprep.mubr.f32.mxu0 %v3921_v5  ;;  %3336 = vmatprep.mubr.msk.f32.mxu1 %vm983_vm1, %v4732_v44 }
 0x169   : > { %2941 = vmatmul.mubr.msk.f32.gmra.mrb[52].mxu0 %vm983_vm1, %v4536_v50  ;;  %3337 = vmatmul.mubr.msk.f32.vlgmr.msra.gmra.mrb[56].mxu1 %vm983_vm1, %v4743_v8 }
 0x16a   : > { %1424 = vmatprep.mubr.f32.mxu0 %v3921_v5  ;;  %3339 = vmatprep.mubr.msk.f32.mxu1 %vm983_vm1, %v4749_v9 }
 0x16d   : > { %2942 = vmatmul.mubr.msk.f32.gmra.mrb[54].mxu0 %vm983_vm1, %v4549_v58  ;;  %3340 = vmatmul.mubr.msk.f32.gmra.mrb[58].mxu1 %vm983_vm1, %v2998_v10 }
 0x16e   : > { %1430 = vmatprep.mubr.f32.mxu0 %v3921_v5  ;;  %3342 = vmatprep.mubr.msk.f32.mxu1 %vm983_vm1, %v2999_v14 }
 0x171   : > { %2943 = vmatmul.mubr.msk.f32.gmra.mrb[56].mxu0 %vm983_vm1, %v4554_v57  ;;  %3343 = vmatmul.mubr.msk.f32.gmra.mrb[60].mxu1 %vm983_vm1, %v3000_v15  ;;  %v2696_v57 = vld [vmem:[%s5099_s4] sm:$0xff] }
 0x172   : > { %1436 = vmatprep.mubr.f32.mxu0 %v3921_v5  ;;  %3345 = vmatprep.mubr.msk.f32.mxu1 %vm983_vm1, %v3001_v17 }
 0x173   : > { %2706 = vperm.xlu0 %3855, %v2696_v57   ;;  %v3057_v57 = vld [vmem:[%s5098_s3 + $0x90] sm:$0xff] }
 0x175   : > { %2944 = vmatmul.mubr.msk.f32.gmra.mrb[58].mxu0 %vm983_vm1, %v4567_v61  ;;  %3346 = vmatmul.mubr.msk.f32.gmra.mrb[62].mxu1 %vm983_vm1, %v3002_v19  ;;  %v2699_v61 = vld [vmem:[%s5099_s4 + $0x18] sm:$0xff] }
 0x176   : > { %1442 = vmatprep.mubr.f32.mxu0 %v3921_v5  ;;  %3348 = vmatprep.mubr.msk.f32.mxu1 %vm983_vm1, %v3003_v20 }
 0x177   : > { %2721 = vperm.xlu1 %3856, %v2699_v61   ;;  %v3062_v61 = vld [vmem:[%s5098_s3 + $0xb8] sm:$0xff] }
 0x179   : > { %2945 = vmatmul.mubr.msk.f32.gmra.mrb[60].mxu0 %vm983_vm1, %v4574_v59  ;;  %3349 = vmatmul.mubr.msk.f32.gmra.mrb[64].mxu1 %vm983_vm1, %v3004_v21  ;;  %v2700_v59 = vld [vmem:[%s5099_s4 + $0x20] sm:$0xff] }
 0x17a   : > { %1448 = vmatprep.mubr.f32.mxu0 %v3921_v5  ;;  %3351 = vmatprep.mubr.msk.f32.mxu1 %vm983_vm1, %v3005_v54 }
 0x17b   : > { %2731 = vperm.xlu1 %3856, %v2701_v27  }
 0x17d   : > { %2946 = vmatmul.mubr.msk.f32.gmra.mrb[62].mxu0 %vm983_vm1, %v4588_v33  ;;  %3352 = vmatmul.mubr.msk.f32.gmra.mrb[66].mxu1 %vm983_vm1, %v3006_v23 }
 0x17e   : > { %1693 = vmatprep.mubr.f32.mxu0 %v3921_v5  ;;  %3378 = vmatprep.mubr.msk.f32.mxu1 %vm2291_vm2, %v3031_v22  ;;  %v3032_v22 = vld [vmem:[%s5098_s3 + $0x48] sm:$0xff] }
 0x17f   : > { %2741 = vperm.xlu1 %3856, %v2703_v1  }
 0x181   : > { %2971 = vmatmul.mubr.msk.f32.vlgmr.msra.gmra.mrb[40].mxu0 %vm983_vm1, %v4595_v39 }
 0x182   : > { %3585 = vmatpush1.bf16.msra.mxu0 %v3584_v52  ;;  %1699 = vmatprep.mubr.f32.mxu0 %v3921_v5 }
 0x183   : > { %3587 = vmatprep.subr.bf16.mxu0 %v3586_v25  ;;  %v2697_v25 = vld [vmem:[%s5099_s4 + $0x8] sm:$0xff] }
 0x184   : > { %2711 = vperm.xlu0 %3855, %v2697_v25  }
 0x185   : > { %2972 = vmatmul.mubr.msk.f32.gmra.mrb[42].mxu0 %vm983_vm1, %v4613_v7 }
 0x186   : > { %1705 = vmatprep.mubr.f32.mxu0 %v3921_v5  ;;  %3589 = vmatpush1.bf16.msra.mxu0 %v3588_v3 }
 0x187   : > { %3591 = vmatprep.subr.bf16.mxu0 %v3590_v43 }
 0x188   : > { %2726 = vperm.xlu0 %3855, %v2700_v59  }
 0x189   : > { %2973 = vmatmul.mubr.msk.f32.gmra.mrb[44].mxu0 %vm983_vm1, %v4633_v56 }
 0x18a   : > { %1711 = vmatprep.mubr.f32.mxu0 %v3921_v5  ;;  %3593 = vmatpush1.bf16.msra.mxu0 %v3592_v37 }
 0x18b   : > { %3595 = vmatprep.subr.bf16.mxu0 %v3594_v62 }
 0x18c   : > { %2736 = vperm.xlu0 %3855, %v2702_v30  }
 0x18d   : > { %2974 = vmatmul.mubr.msk.f32.gmra.mrb[46].mxu0 %vm983_vm1, %v4651_v49 }
 0x18e   : > { %1717 = vmatprep.mubr.f32.mxu0 %v3921_v5  ;;  %3597 = vmatpush1.bf16.msra.mxu0 %v3596_v16 }
 0x191   : > { %2975 = vmatmul.mubr.msk.f32.gmra.mrb[48].mxu0 %vm983_vm1, %v4666_v6 }
 0x192   : > { %1723 = vmatprep.mubr.f32.mxu0 %v3921_v5 }
 0x195   : > { %2976 = vmatmul.mubr.msk.f32.gmra.mrb[50].mxu0 %vm983_vm1, %v4674_v28 }
 0x196   : > { %1729 = vmatprep.mubr.f32.mxu0 %v3921_v5 }
 0x199   : > { %2977 = vmatmul.mubr.msk.f32.gmra.mrb[52].mxu0 %vm983_vm1, %v4685_v63 }
 0x19a   : > { %1735 = vmatprep.mubr.f32.mxu0 %v3921_v5 }
 0x19d   : > { %2978 = vmatmul.mubr.msk.f32.gmra.mrb[54].mxu0 %vm983_vm1, %v4693_v31 }
 0x19e   : > { %1741 = vmatprep.mubr.f32.mxu0 %v3921_v5 }
 0x1a1   : > { %2979 = vmatmul.mubr.msk.f32.gmra.mrb[56].mxu0 %vm983_vm1, %v4698_v32 }
 0x1a2   : > { %1747 = vmatprep.mubr.f32.mxu0 %v3921_v5 }
 0x1a5   : > { %2980 = vmatmul.mubr.msk.f32.gmra.mrb[58].mxu0 %vm983_vm1, %v4710_v36 }
 0x1a6   : > { %1753 = vmatprep.mubr.f32.mxu0 %v3921_v5 }
 0x1a9   : > { %2981 = vmatmul.mubr.msk.f32.gmra.mrb[60].mxu0 %vm983_vm1, %v4715_v38 }
 0x1aa   : > { %1759 = vmatprep.mubr.f32.mxu0 %v3921_v5 }
 0x1ad   : > { %2982 = vmatmul.mubr.msk.f32.gmra.mrb[62].mxu0 %vm983_vm1, %v4724_v41 }
 0x1ae   : > { %2040 = vmatprep.mubr.f32.mxu0 %v3921_v5 }
 0x1b1   : > { %3007 = vmatmul.mubr.msk.f32.vlgmr.msra.gmra.mrb[40].mxu0 %vm983_vm1, %v4732_v44 }
 0x1b2   : > { %2046 = vmatprep.mubr.f32.mxu0 %v3921_v5 }
 0x1b5   : > { %3008 = vmatmul.mubr.msk.f32.gmra.mrb[42].mxu0 %vm983_vm1, %v4743_v8 }
 0x1b6   : > { %2052 = vmatprep.mubr.f32.mxu0 %v3921_v5 }
 0x1b9   : > { %3009 = vmatmul.mubr.msk.f32.gmra.mrb[44].mxu0 %vm983_vm1, %v4749_v9 }
 0x1ba   : > { %2058 = vmatprep.mubr.f32.mxu0 %v3921_v5 }
 0x1bd   : > { %3010 = vmatmul.mubr.msk.f32.gmra.mrb[46].mxu0 %vm983_vm1, %v2998_v10 }
 0x1be   : > { %2064 = vmatprep.mubr.f32.mxu0 %v3921_v5 }
 0x1c1   : > { %3011 = vmatmul.mubr.msk.f32.gmra.mrb[48].mxu0 %vm983_vm1, %v2999_v14 }
 0x1c2   : > { %2070 = vmatprep.mubr.f32.mxu0 %v3921_v5 }
 0x1c5   : > { %3012 = vmatmul.mubr.msk.f32.gmra.mrb[50].mxu0 %vm983_vm1, %v3000_v15 }
 0x1c6   : > { %2076 = vmatprep.mubr.f32.mxu0 %v3921_v5 }
 0x1c9   : > { %3013 = vmatmul.mubr.msk.f32.gmra.mrb[52].mxu0 %vm983_vm1, %v3001_v17 }
 0x1ca   : > { %2082 = vmatprep.mubr.f32.mxu0 %v3921_v5 }
 0x1cd   : > { %3014 = vmatmul.mubr.msk.f32.gmra.mrb[54].mxu0 %vm983_vm1, %v3002_v19 }
 0x1ce   : > { %2088 = vmatprep.mubr.f32.mxu0 %v3921_v5  ;;  %v2717_v25 = vpop.permute.xlu1 %2716 }
 0x1d1   : > { %3015 = vmatmul.mubr.msk.f32.gmra.mrb[56].mxu0 %vm983_vm1, %v3003_v20 }
 0x1d2   : > { %2094 = vmatprep.mubr.f32.mxu0 %v3921_v5 }
 0x1d5   : > { %3016 = vmatmul.mubr.msk.f32.gmra.mrb[58].mxu0 %vm983_vm1, %v3004_v21 }
 0x1d6   : > { %2100 = vmatprep.mubr.f32.mxu0 %v3921_v5 }
 0x1d9   : > { %3017 = vmatmul.mubr.msk.f32.gmra.mrb[60].mxu0 %vm983_vm1, %v3005_v54 }
 0x1da   : > { %2106 = vmatprep.mubr.f32.mxu0 %v3921_v5 }
 0x1dd   : > { %3018 = vmatmul.mubr.msk.f32.gmra.mrb[62].mxu0 %vm983_vm1, %v3006_v23 }
 0x1f2   : > { %v2707_v27 = vpop.permute.xlu0 %2706 }
 0x1f6   : > { %v2722_v59 = vpop.permute.xlu1 %2721 }
 0x203   : > { %v2712_v1 = vpop.permute.xlu0 %2711 }
 0x23c   : > { %v3338_v24 = vpop.f32.mrb[56].mxu1 }
 0x23d   : > { %v2179_v52 = vpop.f32.mrb[57].mxu1 }
 0x23e   : > { %v4890_v26 = vpack.c.bf16 %v3338_v24, %v2179_v52  ;;  %v3033_v24 = vld [vmem:[%s5098_s3 + $0x50] sm:$0xff]  ;;  %v3034_v52 = vld [vmem:[%s5098_s3 + $0x58] sm:$0xff] }
 0x240   : > { %v3341_v53 = vpop.f32.mrb[58].mxu1 }
 0x241   : > { %v2189_v3 = vpop.f32.mrb[59].mxu1 }
 0x242   : > { %v4892_v29 = vpack.c.bf16 %v3341_v53, %v2189_v3  ;;  %v3035_v53 = vld [vmem:[%s5098_s3 + $0x60] sm:$0xff]  ;;  %v3036_v3 = vld [vmem:[%s5098_s3 + $0x68] sm:$0xff] }
 0x244   : > { %v3344_v34 = vpop.f32.mrb[60].mxu1 }
 0x245   : > { %v2199_v37 = vpop.f32.mrb[61].mxu1 }
 0x246   : > { %v4894_v5 = vpack.c.bf16 %v3344_v34, %v2199_v37  ;;  %v3037_v34 = vld [vmem:[%s5098_s3 + $0x70] sm:$0xff]  ;;  %v3038_v37 = vld [vmem:[%s5098_s3 + $0x78] sm:$0xff] }
 0x248   : > { %v3347_v42 = vpop.f32.mrb[62].mxu1 }
 0x249   : > { %v2209_v12 = vpop.f32.mrb[63].mxu1 }
 0x24a   : > { %v4896_v16 = vpack.c.bf16 %v3347_v42, %v2209_v12  ;;  %v2274_v42 = vld [vmem:[%s5098_s3] sm:$0xff]  ;;  %v2275_v12 = vld [vmem:[%s5098_s3 + $0x8] sm:$0xff] }
 0x24c   : > { %v3350_v45 = vpop.f32.mrb[64].mxu1 }
 0x24d   : > { %v2219_v46 = vpop.f32.mrb[65].mxu1 }
 0x24e   : > { %v4898_v50 = vpack.c.bf16 %v3350_v45, %v2219_v46  ;;  %v2276_v45 = vld [vmem:[%s5098_s3 + $0x10] sm:$0xff]  ;;  %v2277_v46 = vld [vmem:[%s5098_s3 + $0x18] sm:$0xff] }
 0x250   : > { %v3353_v2 = vpop.f32.mrb[66].mxu1 }
 0x251   : > { %v2229_v4 = vpop.f32.mrb[67].mxu1 }
 0x252   : > { %v4900_v58 = vpack.c.bf16 %v3353_v2, %v2229_v4  ;;  %v2278_v2 = vld [vmem:[%s5098_s3 + $0x20] sm:$0xff]  ;;  %v2280_v4 = vld [vmem:[%s5098_s3 + $0x30] sm:$0xff] }
 0x284   : > { %v2042_v33 = vpop.f32.mrb[40].mxu0 }
 0x285   : > { %v2044_v35 = vpop.f32.mrb[41].mxu0 }
 0x288   : > { %v2048_v39 = vpop.f32.mrb[42].mxu0 }
 0x289   : > { %v3638_v40 = vpack.c.bf16 %v2048_v39, %v2042_v33  ;;  %v2050_v7 = vpop.f32.mrb[43].mxu0 }
 0x28a   : > { %v3614_v43 = vpack.c.bf16 %v2050_v7, %v2044_v35 }
 0x28c   : > { %v2054_v11 = vpop.f32.mrb[44].mxu0  ;;  %3615 = vmatprep.subr.bf16.mxu1 %v3614_v43 }
 0x28d   : > { %v2056_v18 = vpop.f32.mrb[45].mxu0  ;;  %3617 = vmatpush3.bf16.msra.mxu1 %v3614_v43 }
 0x290   : > { %v2060_v48 = vpop.f32.mrb[46].mxu0 }
 0x291   : > { %v3642_v56 = vpack.c.bf16 %v2060_v48, %v2054_v11  ;;  %v2062_v13 = vpop.f32.mrb[47].mxu0  ;;  %v2732_v48 = vpop.permute.xlu1 %2731 }
 0x292   : > { %v3618_v60 = vpack.c.bf16 %v2062_v13, %v2056_v18  ;;  %v2727_v13 = vpop.permute.xlu0 %2726 }
 0x294   : > { %v2066_v49 = vpop.f32.mrb[48].mxu0  ;;  %3619 = vmatprep.subr.bf16.mxu1 %v3618_v60 }
 0x295   : > { %v2068_v62 = vpop.f32.mrb[49].mxu0  ;;  %3621 = vmatpush3.bf16.msra.mxu1 %v3618_v60 }
 0x298   : > { %v2072_v47 = vpop.f32.mrb[50].mxu0 }
 0x299   : > { %v3646_v0 = vpack.c.bf16 %v2072_v47, %v2066_v49  ;;  %v2074_v6 = vpop.f32.mrb[51].mxu0 }
 0x29a   : > { %v3622_v28 = vpack.c.bf16 %v2074_v6, %v2068_v62 }
 0x29c   : > { %v2078_v63 = vpop.f32.mrb[52].mxu0  ;;  %3623 = vmatprep.subr.bf16.mxu1 %v3622_v28 }
 0x29d   : > { %v2080_v31 = vpop.f32.mrb[53].mxu0  ;;  %3625 = vmatpush3.bf16.msra.mxu1 %v3622_v28 }
 0x2a0   : > { %v2084_v32 = vpop.f32.mrb[54].mxu0 }
 0x2a1   : > { %v3650_v36 = vpack.c.bf16 %v2084_v32, %v2078_v63  ;;  %v2086_v38 = vpop.f32.mrb[55].mxu0  ;;  %v2742_v63 = vpop.permute.xlu1 %2741 }
 0x2a2   : > { %v3626_v41 = vpack.c.bf16 %v2086_v38, %v2080_v31 }
 0x2a4   : > { %v2090_v44 = vpop.f32.mrb[56].mxu0  ;;  %3627 = vmatprep.subr.bf16.mxu1 %v3626_v41 }
 0x2a5   : > { %v2092_v8 = vpop.f32.mrb[57].mxu0  ;;  %3629 = vmatpush3.bf16.msra.mxu1 %v3626_v41 }
 0x2a8   : > { %v2096_v9 = vpop.f32.mrb[58].mxu0 }
 0x2a9   : > { %v3654_v10 = vpack.c.bf16 %v2096_v9, %v2090_v44  ;;  %v2098_v14 = vpop.f32.mrb[59].mxu0 }
 0x2aa   : > { %v3630_v15 = vpack.c.bf16 %v2098_v14, %v2092_v8 }
 0x2ac   : > { %v2102_v17 = vpop.f32.mrb[60].mxu0  ;;  %3631 = vmatprep.subr.bf16.mxu1 %v3630_v15 }
 0x2ad   : > { %v2104_v19 = vpop.f32.mrb[61].mxu0  ;;  %3633 = vmatpush3.bf16.msra.mxu1 %v3630_v15 }
 0x2b0   : > { %v2108_v20 = vpop.f32.mrb[62].mxu0 }
 0x2b1   : > { %v3658_v21 = vpack.c.bf16 %v2108_v20, %v2102_v17  ;;  %v2110_v54 = vpop.f32.mrb[63].mxu0 }
 0x2b2   : > { %v3634_v23 = vpack.c.bf16 %v2110_v54, %v2104_v19 }
 0x2b4   : > { %3635 = vmatprep.subr.bf16.mxu1 %v3634_v23 }
 0x2b5   : > { %3637 = vmatpush3.bf16.msra.mxu1 %v3634_v23 }
 0x2b6   : > { %3639 = vmatprep.subr.bf16.mxu1 %v3638_v40 }
 0x2b8   : > { %3379 = vmatmul.mubr.msk.f32.vlgmr.msra.gmra.mrb[68].mxu1 %vm2291_vm2, %v3032_v22 }
 0x2b9   : > { %3641 = vmatpush3.bf16.msra.mxu1 %v3638_v40  ;;  %3381 = vmatprep.mubr.msk.f32.mxu1 %vm2291_vm2, %v3033_v24 }
 0x2ba   : > { %3643 = vmatprep.subr.bf16.mxu1 %v3642_v56 }
 0x2bc   : > { %3382 = vmatmul.mubr.msk.f32.gmra.mrb[70].mxu1 %vm2291_vm2, %v3034_v52 }
 0x2bd   : > { %3645 = vmatpush3.bf16.msra.mxu1 %v3642_v56  ;;  %3384 = vmatprep.mubr.msk.f32.mxu1 %vm2291_vm2, %v3035_v53 }
 0x2be   : > { %3647 = vmatprep.subr.bf16.mxu1 %v3646_v0 }
 0x2c0   : > { %3385 = vmatmul.mubr.msk.f32.gmra.mrb[72].mxu1 %vm2291_vm2, %v3036_v3 }
 0x2c1   : > { %3649 = vmatpush3.bf16.msra.mxu1 %v3646_v0  ;;  %3387 = vmatprep.mubr.msk.f32.mxu1 %vm2291_vm2, %v3037_v34 }
 0x2c2   : > { %3651 = vmatprep.subr.bf16.mxu1 %v3650_v36 }
 0x2c4   : > { %3388 = vmatmul.mubr.msk.f32.gmra.mrb[74].mxu1 %vm2291_vm2, %v3038_v37 }
 0x2c5   : > { %3653 = vmatpush3.bf16.msra.mxu1 %v3650_v36  ;;  %3414 = vmatprep.mubr.msk.f32.mxu1 %vm2291_vm2, %v2274_v42  ;;  %v2737_v36 = vpop.permute.xlu0 %2736 }
 0x2c6   : > { %3655 = vmatprep.subr.bf16.mxu1 %v3654_v10 }
 0x2c9   : > { %3657 = vmatpush3.bf16.msra.mxu1 %v3654_v10 }
 0x2ca   : > { %3659 = vmatprep.subr.bf16.mxu1 %v3658_v21 }
 0x2cd   : > { %3661 = vmatpush3.bf16.msra.mxu1 %v3658_v21 }
 0x2ce   : > { %3663 = vmatprep.subr.bf16.mxu1 %v4890_v26 }
 0x2d0   : > { %3415 = vmatmul.mubr.msk.f32.vlgmr.msra.gmra.mrb[68].mxu1 %vm2291_vm2, %v2275_v12 }
 0x2d1   : > { %3665 = vmatpush3.bf16.msra.mxu1 %v4890_v26  ;;  %3417 = vmatprep.mubr.msk.f32.mxu1 %vm2291_vm2, %v2276_v45  ;;  %v2279_v26 = vld [vmem:[%s5098_s3 + $0x28] sm:$0xff] }
 0x2d2   : > { %3667 = vmatprep.subr.bf16.mxu1 %v4892_v29 }
 0x2d4   : > { %3418 = vmatmul.mubr.msk.f32.gmra.mrb[70].mxu1 %vm2291_vm2, %v2277_v46 }
 0x2d5   : > { %3669 = vmatpush3.bf16.msra.mxu1 %v4892_v29  ;;  %3420 = vmatprep.mubr.msk.f32.mxu1 %vm2291_vm2, %v2278_v2  ;;  %v2281_v29 = vld [vmem:[%s5098_s3 + $0x38] sm:$0xff] }
 0x2d6   : > { %3671 = vmatprep.subr.bf16.mxu1 %v4894_v5 }
 0x2d8   : > { %3421 = vmatmul.mubr.msk.f32.gmra.mrb[72].mxu1 %vm2291_vm2, %v2279_v26 }
 0x2d9   : > { %3673 = vmatpush3.bf16.msra.mxu1 %v4894_v5  ;;  %3423 = vmatprep.mubr.msk.f32.mxu1 %vm2291_vm2, %v2280_v4  ;;  %v3056_v5 = vld [vmem:[%s5098_s3 + $0x88] sm:$0xff] }
 0x2da   : > { %3675 = vmatprep.subr.bf16.mxu1 %v4896_v16 }
 0x2dc   : > { %3424 = vmatmul.mubr.msk.f32.gmra.mrb[74].mxu1 %vm2291_vm2, %v2281_v29 }
 0x2dd   : > { %3677 = vmatpush3.bf16.msra.mxu1 %v4896_v16  ;;  %3450 = vmatprep.mubr.msk.f32.mxu1 %vm2291_vm2, %v3055_v55  ;;  %v3058_v16 = vld [vmem:[%s5098_s3 + $0x98] sm:$0xff] }
 0x2de   : > { %3679 = vmatprep.subr.bf16.mxu1 %v4898_v50 }
 0x2e1   : > { %3681 = vmatpush3.bf16.msra.mxu1 %v4898_v50  ;;  %v3059_v50 = vld [vmem:[%s5098_s3 + $0xa0] sm:$0xff] }
 0x2e2   : > { %3683 = vmatprep.subr.bf16.mxu1 %v4900_v58 }
 0x2e5   : > { %3685 = vmatpush3.bf16.msra.mxu1 %v4900_v58  ;;  %v3060_v58 = vld [vmem:[%s5098_s3 + $0xa8] sm:$0xff] }
 0x2e8   : > { %3451 = vmatmul.mubr.msk.f32.vlgmr.msra.gmra.mrb[68].mxu1 %vm2291_vm2, %v3056_v5 }
 0x2e9   : > { %3453 = vmatprep.mubr.msk.f32.mxu1 %vm2291_vm2, %v3057_v57 }
 0x2ec   : > { %3454 = vmatmul.mubr.msk.f32.gmra.mrb[70].mxu1 %vm2291_vm2, %v3058_v16 }
 0x2ed   : > { %3456 = vmatprep.mubr.msk.f32.mxu1 %vm2291_vm2, %v3059_v50 }
 0x2f0   : > { %3457 = vmatmul.mubr.msk.f32.gmra.mrb[72].mxu1 %vm2291_vm2, %v3060_v58 }
 0x2f1   : > { %3459 = vmatprep.mubr.msk.f32.mxu1 %vm2291_vm2, %v3061_v51 }
 0x2f4   : > { %3460 = vmatmul.mubr.msk.f32.gmra.mrb[74].mxu1 %vm2291_vm2, %v3062_v61 }
 0x3bb   : > { %v3452_v30 = vpop.f32.mrb[68].mxu1 }
 0x3bc   : > { %v2745_v33 = vadd.f32 %v3452_v30, %v2712_v1  ;;  %v2649_v35 = vpop.f32.mrb[69].mxu1 }
 0x3bd   : > { %v2744_v39 = vadd.f32 %v2707_v27, %v2649_v35 }
 0x3be   : > { %v2753_v40 = vmax.f32 %v2745_v33, 0.0 }
 0x3bf   : > { %v2752_v7 = vmax.f32 %v2744_v39, 0.0  ;;  %v3455_v43 = vpop.f32.mrb[70].mxu1 }
 0x3c0   : > { %2761 = vst [vmem:[%s5033_s12 + $0x8] sm:$0xff] %v2753_v40  ;;  %v2747_v11 = vadd.f32 %v3455_v43, %v2722_v59  ;;  %v2659_v18 = vpop.f32.mrb[71].mxu1 }
 0x3c1   : > { %2760 = vst [vmem:[%s5033_s12] sm:$0xff] %v2752_v7  ;;  %v2746_v56 = vadd.f32 %v2717_v25, %v2659_v18 }
 0x3c2   : > { %v2755_v60 = vmax.f32 %v2747_v11, 0.0 }
 0x3c3   : > { %v2754_v49 = vmax.f32 %v2746_v56, 0.0  ;;  %v3458_v62 = vpop.f32.mrb[72].mxu1 }
 0x3c4   : > { %2763 = vst [vmem:[%s5033_s12 + $0x18] sm:$0xff] %v2755_v60  ;;  %v2749_v47 = vadd.f32 %v3458_v62, %v2732_v48  ;;  %v2669_v0 = vpop.f32.mrb[73].mxu1 }
 0x3c5   : > { %2762 = vst [vmem:[%s5033_s12 + $0x10] sm:$0xff] %v2754_v49  ;;  %v2748_v6 = vadd.f32 %v2727_v13, %v2669_v0 }
 0x3c6   : > { %v2757_v28 = vmax.f32 %v2749_v47, 0.0 }
 0x3c7   : > { %v2756_v31 = vmax.f32 %v2748_v6, 0.0  ;;  %v3461_v32 = vpop.f32.mrb[74].mxu1 }
 0x3c8   : > { %2765 = vst [vmem:[%s5033_s12 + $0x28] sm:$0xff] %v2757_v28  ;;  %v2751_v38 = vadd.f32 %v3461_v32, %v2742_v63  ;;  %v2679_v41 = vpop.f32.mrb[75].mxu1 }
 0x3c9   : > { %2764 = vst [vmem:[%s5033_s12 + $0x20] sm:$0xff] %v2756_v31  ;;  %v2750_v44 = vadd.f32 %v2737_v36, %v2679_v41 }
 0x3ca   : > { %v2759_v8 = vmax.f32 %v2751_v38, 0.0 }
 0x3cb   : > { %v2758_v9 = vmax.f32 %v2750_v44, 0.0 }
 0x3cc   : > { %2767 = vst [vmem:[%s5033_s12 + $0x38] sm:$0xff] %v2759_v8 }
 0x3cd   : > { %2766 = vst [vmem:[%s5033_s12 + $0x30] sm:$0xff] %v2758_v9 }
 0x3ce   : > { %3870 = shalt.err (!%p3867_p3)
}
 0x3cf   : > { %s3871_s17 = scalar_lea.hbm %s5046_s23, 1024  ;;  %s3875_s9 = scalar_lea.hbm %s5100_s5, 2048 }
 0x3d0   : > { %p3872_p4 = scmp.ne.s32.totalorder %s5046_s23, %s3871_s17  ;;  %p3876_p9 = scmp.lt.u32.totalorder %s5046_s23, %s5100_s5 }
 0x3d1   : > { %p3877_p10 = scmp.lt.u32.totalorder %s3875_s9, %s3871_s17  ;;  %p3879_p12 = scmp.lt.u32.totalorder %s3871_s17, %s5046_s23 }
 0x3d2   : > { %p3873_p7 = pnand %p3872_p4, %p3994_p5 }
 0x3d3   : > { %p3878_p11 = por %p3877_p10, %p3876_p9 }
 0x3d4   : > { %p3874_p8 = pneg %p3873_p7 }
 0x3d5   : > { %p3880_p13 = por %p3879_p12, %p3878_p11 }
 0x3d7   : > { %p3881_p0 = pnand %p3880_p13, %p3874_p8 }
 0x3d9   : > { %3884 = shalt.err (!%p3881_p0)
}
 0x3da   : > { %s3924_s12 = smov 128   ;;  %s3925_s13 = smov 8  }
 0x3db   : > { %3812 = dma.vmem_to_hbm [thread:$0]  (%p3994_p5), %s5048_s14, 1024, %s5046_s23, %s5054_s22, %s3924_s12, %s3924_s12, %s3925_s13  }
 0x3dc PF: > { %p3818_p1 = scmp.ge.s32.totalorder %s3919_s21, 2  ;;  %s2797_s15 = sand.u32 1, %s3907_s18  }
 0x3dd   : > { %s2798_s16 = scalar_lea.sflag [#allocation3], %s2797_s15 }
 0x3de   : > { %p3815_p2 = pnand %p3818_p1, %p3998_p6 }
 0x3e0   : > { %3902 = dma.done.wait (!%p3815_p2), %s2798_s16, 1024  }
 0x3e1   : > { %3904 = vsyncadd (!%p3815_p2), %s2798_s16, 4294966272  ;;  %p15_p3 = scmp.ge.s32.totalorder %s3981_s24, 4   ;;  %s5103_s18 = smov %s3911_s19 }
 0x3e2   : > { %s5104_s19 = smov %s3915_s20  ;;  %s5105_s20 = smov %s3992_s27 }
 0x3e3   : > { %s5106_s21 = smov %s3981_s24  ;;  %17 = sbr.rel (!%p15_p3) target bundleno = 3 (0x3), region = 80 }
 0x3ea   :  { %2803 = vsyncpa [#allocation3], 1 }
 0x3eb   :  { %2805 = vsyncpa [#allocation3 + $0x1], 1 }

</bundles_post_ra>
